<compile_context>
chip_gen: v7x
topology: tpu7x:2x2x1
jax: 0.10.0
libtpu: 0.0.40
codegen_flags: <defaults>
</compile_context>

<pallas_src>
import jax
import jax.numpy as jnp
from jax import lax
from jax.experimental import pallas as pl
from jax.experimental.pallas import tpu as pltpu


# ---------------------------------------------------------------------------
# Parameter folding: conv bias + eval-mode BatchNorm -> per-channel scale/bias
# ---------------------------------------------------------------------------
def fold_bn_into_scale_bias(conv_bias, gamma, beta, mean, var, eps=1e-5):
    """BN(z + b) = scale*z + bias with scale = g/sqrt(v+eps), bias = beta + scale*(b-mean)."""
    # TODO(synk): training-mode BatchNorm (batch statistics) and layer/instance norm.
    scale = gamma / jnp.sqrt(var + eps)
    bias = beta + scale * (conv_bias - mean)
    return scale.astype(jnp.float32), bias.astype(jnp.float32)


def _padded_bytes(shape, dtype):
    """VMEM footprint of one buffer with (sublane, lane) tile padding."""
    itemsize = jnp.dtype(dtype).itemsize
    sub_mult = 8 * (4 // itemsize)          # 8 for f32, 16 for bf16
    shape = tuple(int(s) for s in shape)
    if len(shape) == 1:
        shape = (1,) + shape
    lead = 1
    for d in shape[:-2]:
        lead *= d
    sub = -(-shape[-2] // sub_mult) * sub_mult
    lane = -(-shape[-1] // 128) * 128
    return lead * sub * lane * itemsize


# ---------------------------------------------------------------------------
# Fused kernel body (one image per grid step).
# ---------------------------------------------------------------------------
def _make_kernel(Cin, Cout, H, W, Wp, kh, kw, ph, pw, M):
    HpWp = (H + 2 * ph) * Wp
    interior = ph * Wp + pw
    tail = HpWp - interior - M

    def kernel(x_ref, w1_ref, s1_ref, b1_ref, w2_ref, s2_ref, b2_ref, mask_ref,
               o_ref, xs_ref, hs_ref, rhs1_ref, rhs2_ref):
        # -- stage the unpadded input into the zero-halo flat scratch ---------
        # (xs is tiny -- Cin rows -- so a full zero fill per step is negligible)
        xs_ref[...] = jnp.zeros(xs_ref.shape, xs_ref.dtype)
        for h in range(H):
            dst = (h + ph) * Wp + pw
            xs_ref[:, dst:dst + W] = x_ref[:, h * W:(h + 1) * W]

        # -- conv1: pack all taps into ONE MXU contraction (K = kh*kw*Cin) ----
        t = 0
        for di in range(kh):
            for dj in range(kw):
                off = di * Wp + dj
                rhs1_ref[t * Cin:(t + 1) * Cin, :] = xs_ref[:, off:off + M]
                t += 1
        z1 = jnp.dot(w1_ref[...], rhs1_ref[...],
                     preferred_element_type=jnp.float32)          # (Cout, M) f32
        # folded BN + ReLU; invalid (padded-width) columns are masked to zero so
        # the single dense store below leaves the halo of hs_ref all-zero.
        h1 = jnp.maximum(z1 * s1_ref[...] + b1_ref[...], 0.0) * mask_ref[...]

        # -- stage h into the padded intermediate scratch (one dense store) ---
        if interior > 0:
            hs_ref[:, 0:interior] = jnp.zeros((Cout, interior), hs_ref.dtype)
        if tail > 0:
            hs_ref[:, interior + M:] = jnp.zeros((Cout, tail), hs_ref.dtype)
        hs_ref[:, interior:interior + M] = h1.astype(hs_ref.dtype)

        # -- conv2 + folded BN + ReLU + residual (identity = live f32 h1) -----
        t = 0
        for di in range(kh):
            for dj in range(kw):
                off = di * Wp + dj
                rhs2_ref[t * Cout:(t + 1) * Cout, :] = hs_ref[:, off:off + M]
                t += 1
        z2 = jnp.dot(w2_ref[...], rhs2_ref[...],
                     preferred_element_type=jnp.float32)          # (Cout, M) f32
        y = (h1 + jnp.maximum(z2 * s2_ref[...] + b2_ref[...], 0.0)).astype(o_ref.dtype)

        # -- restride Wp -> W and store (output block lane dim = H*W, dense) --
        for h in range(H):
            o_ref[:, h * W:(h + 1) * W] = y[:, h * Wp:h * Wp + W]

    return kernel


# ---------------------------------------------------------------------------
# Fused DoubleConv2d forward (stride=1, 'same' padding, ReLU, residual).
# ---------------------------------------------------------------------------
def double_conv2d_forward(x_nchw, w1, scale1, bias1, w2, scale2, bias2,
                          *, compute_dtype=jnp.bfloat16):
    N, Cin, H, W = x_nchw.shape
    kh, kw, cin_w, Cout = w1.shape
    assert cin_w == Cin and w2.shape == (kh, kw, Cout, Cout)
    assert kh == kw and kh % 2 == 1, "odd square kernels only"
    ph, pw = kh // 2, kw // 2            # module default: padding = kernel_size // 2
    # TODO(synk): stride != 1 / dilation != 1 / groups != 1 / padding != k//2.

    Hp, Wp = H + 2 * ph, W + 2 * pw
    HW, HpWp = H * W, Hp * Wp
    M = (H - 1) * Wp + W                 # flat output positions (padded-width stride)
    K1, K2 = kh * kw * Cin, kh * kw * Cout
    cdtype = jnp.dtype(compute_dtype)

    # ---- parameter / input packing (layout plumbing only, no padding) -------
    x_cf = x_nchw.reshape(N, Cin, HW).astype(cdtype)   # NCHW is already channel-major
    w1p = jnp.transpose(w1, (3, 0, 1, 2)).reshape(Cout, K1).astype(cdtype)
    w2p = jnp.transpose(w2, (3, 0, 1, 2)).reshape(Cout, K2).astype(cdtype)
    s1 = scale1.reshape(Cout, 1).astype(jnp.float32)
    b1 = bias1.reshape(Cout, 1).astype(jnp.float32)
    s2 = scale2.reshape(Cout, 1).astype(jnp.float32)
    b2 = bias2.reshape(Cout, 1).astype(jnp.float32)
    # valid-column mask in padded-width flat coordinates (1 where w < W)
    mask = ((jnp.arange(M) % Wp) < W).astype(jnp.float32).reshape(1, M)

    # ---- VMEM accounting (incl. im2col scratches and f32 value temporaries) -
    est = (2 * (_padded_bytes((Cin, HW), cdtype)
                + _padded_bytes((Cout, HW), x_nchw.dtype))          # double-buffered in/out
           + 2 * (_padded_bytes((Cout, K1), cdtype) + _padded_bytes((Cout, K2), cdtype)
                  + 4 * _padded_bytes((Cout, 1), jnp.float32)
                  + _padded_bytes((1, M), jnp.float32))             # params / mask
           + _padded_bytes((Cin, HpWp), cdtype) + _padded_bytes((Cout, HpWp), cdtype)
           + _padded_bytes((K1, M), cdtype) + _padded_bytes((K2, M), cdtype)
           + 4 * _padded_bytes((Cout, M), jnp.float32))             # z1/h1/z2/y temporaries
    try:
        vmem_cap = int(pltpu.get_tpu_info().vmem_capacity_bytes)
    except Exception:
        vmem_cap = 64 * 1024 * 1024      # smallest per-core VMEM across v5e/v6e/v7x
    vmem_limit = min(max(32 * 1024 * 1024, 2 * est), (vmem_cap * 3) // 4)
    # TODO(synk): add an H-tile grid axis (with halo recompute) for images whose
    # per-image working set exceeds this budget; not needed at these sizes.
    assert est <= vmem_limit, (est, vmem_limit)

    kernel = _make_kernel(Cin, Cout, H, W, Wp, kh, kw, ph, pw, M)

    out_flat = pl.pallas_call(
        kernel,
        out_shape=jax.ShapeDtypeStruct((N, Cout, HW), x_nchw.dtype),
        grid=(N,),                       # one image per step; >=2 steps feed both
                                         # v7x TensorCores and pipeline the DMAs
        in_specs=[
            pl.BlockSpec((None, Cin, HW), lambda i: (i, 0, 0)),
            pl.BlockSpec((Cout, K1), lambda i: (0, 0)),
            pl.BlockSpec((Cout, 1), lambda i: (0, 0)),
            pl.BlockSpec((Cout, 1), lambda i: (0, 0)),
            pl.BlockSpec((Cout, K2), lambda i: (0, 0)),
            pl.BlockSpec((Cout, 1), lambda i: (0, 0)),
            pl.BlockSpec((Cout, 1), lambda i: (0, 0)),
            pl.BlockSpec((1, M), lambda i: (0, 0)),
        ],
        out_specs=pl.BlockSpec((None, Cout, HW), lambda i: (i, 0, 0)),
        scratch_shapes=[
            pltpu.VMEM((Cin, HpWp), cdtype),     # zero-halo padded input (flat)
            pltpu.VMEM((Cout, HpWp), cdtype),    # zero-halo padded intermediate h
            pltpu.VMEM((K1, M), cdtype),         # im2col RHS for conv1
            pltpu.VMEM((K2, M), cdtype),         # im2col RHS for conv2
        ],
        compiler_params=pltpu.CompilerParams(
            dimension_semantics=("parallel",),
            vmem_limit_bytes=int(vmem_limit),
        ),
    )(x_cf, w1p, s1, b1, w2p, s2, b2, mask)

    return out_flat.reshape(N, Cout, H, W)


# ---------------------------------------------------------------------------
# Pure-JAX reference (same folded BN scale/bias semantics).
# ---------------------------------------------------------------------------
def _reference_double_conv(x_nchw, w1, s1, b1, w2, s2, b2, cast_dtype=None):
    """cast_dtype mimics the kernel's mixed precision: x/w cast to cast_dtype,
    f32 accumulation/epilogue, conv2 input h cast; residual stays f32."""
    def prep(a):
        a = a.astype(cast_dtype) if cast_dtype is not None else a
        return a.astype(jnp.float32)

    x = prep(jnp.transpose(x_nchw, (0, 2, 3, 1)))
    w1f, w2f = prep(w1), prep(w2)
    kh, kw = w1.shape[0], w1.shape[1]
    pad = ((kh // 2, kh // 2), (kw // 2, kw // 2))
    dn = ("NHWC", "HWIO", "NHWC")
    hp = jax.lax.Precision.HIGHEST
    z1 = lax.conv_general_dilated(x, w1f, (1, 1), pad, dimension_numbers=dn, precision=hp)
    h = jnp.maximum(z1 * s1 + b1, 0.0)
    z2 = lax.conv_general_dilated(prep(h), w2f, (1, 1), pad, dimension_numbers=dn,
                                  precision=hp)
    y = h + jnp.maximum(z2 * s2 + b2, 0.0)
    return jnp.transpose(y, (0, 3, 1, 2))


# ---------------------------------------------------------------------------
# Demo / self-check
# ---------------------------------------------------------------------------
if __name__ == "__main__":
    key = jax.random.PRNGKey(0)
    N, Cin, Cout, H, W = 2, 4, 8, 16, 16
    keys = jax.random.split(key, 13)

    x = jax.random.normal(keys[0], (N, Cin, H, W), jnp.float32)

    def make_layer(ks, cin, cout):
        w = jax.random.normal(ks[0], (3, 3, cin, cout), jnp.float32) / (3.0 * cin ** 0.5)
        conv_b = 0.1 * jax.random.normal(ks[1], (cout,), jnp.float32)
        gamma = 1.0 + 0.1 * jax.random.normal(ks[2], (cout,), jnp.float32)
        beta = 0.1 * jax.random.normal(ks[3], (cout,), jnp.float32)
        mean = 0.1 * jax.random.normal(ks[4], (cout,), jnp.float32)
        var = 0.5 + jnp.abs(jax.random.normal(ks[5], (cout,), jnp.float32))
        s, b = fold_bn_into_scale_bias(conv_b, gamma, beta, mean, var)
        return w, s, b

    w1, s1, b1 = make_layer(keys[1:7], Cin, Cout)
    w2, s2, b2 = make_layer(keys[7:13], Cout, Cout)

    y = jax.block_until_ready(double_conv2d_forward(x, w1, s1, b1, w2, s2, b2))
    assert y.shape == (N, Cout, H, W)

    # (1) tight check vs a reference with the *same* bf16 casts -> isolates
    #     kernel algebra/layout bugs from dtype rounding noise.
    y_ref_cast = _reference_double_conv(x, w1, s1, b1, w2, s2, b2,
                                        cast_dtype=jnp.bfloat16)
    err_cast = float(jnp.max(jnp.abs(y - y_ref_cast)))
    assert jnp.allclose(y, y_ref_cast, atol=5e-3, rtol=5e-3), err_cast

    # (2) fidelity to the all-f32 module semantics: the gap is bounded by bf16
    #     rounding of x / weights / h through two chained 3x3 convs.
    y_ref = _reference_double_conv(x, w1, s1, b1, w2, s2, b2)
    err = float(jnp.max(jnp.abs(y - y_ref)))
    assert jnp.allclose(y, y_ref, atol=1e-1, rtol=1e-1), err

    print("KERNEL_OK")
</pallas_src>

<mosaic_0001>
module attributes {stable_mosaic.version = 11 : i64} {
  func.func @kernel(%arg0: i32, %arg1: memref<1x4x256xbf16, #tpu.memory_space<vmem>>, %arg2: memref<8x36xbf16, #tpu.memory_space<vmem>>, %arg3: memref<8x1xf32, #tpu.memory_space<vmem>>, %arg4: memref<8x1xf32, #tpu.memory_space<vmem>>, %arg5: memref<8x72xbf16, #tpu.memory_space<vmem>>, %arg6: memref<8x1xf32, #tpu.memory_space<vmem>>, %arg7: memref<8x1xf32, #tpu.memory_space<vmem>>, %arg8: memref<1x286xf32, #tpu.memory_space<vmem>>, %arg9: memref<1x8x256xf32, #tpu.memory_space<vmem>>, %arg10: memref<4x324xbf16, #tpu.memory_space<vmem>>, %arg11: memref<8x324xbf16, #tpu.memory_space<vmem>>, %arg12: memref<36x286xbf16, #tpu.memory_space<vmem>>, %arg13: memref<72x286xbf16, #tpu.memory_space<vmem>>) attributes {dimension_semantics = [#tpu.dimension_semantics<parallel>], iteration_bounds = array<i64: 2>, scalar_prefetch = 0 : i64, scratch_operands = 4 : i64, tpu.core_type = #tpu.core_type<tc>, window_params = [{transform_indices = @transform_0, window_bounds = array<i64: 1, 4, 256>}, {pipeline_mode = #tpu.pipeline_mode<synchronous>, transform_indices = @transform_1, window_bounds = array<i64: 8, 36>}, {pipeline_mode = #tpu.pipeline_mode<synchronous>, transform_indices = @transform_2, window_bounds = array<i64: 8, 1>}, {pipeline_mode = #tpu.pipeline_mode<synchronous>, transform_indices = @transform_3, window_bounds = array<i64: 8, 1>}, {pipeline_mode = #tpu.pipeline_mode<synchronous>, transform_indices = @transform_4, window_bounds = array<i64: 8, 72>}, {pipeline_mode = #tpu.pipeline_mode<synchronous>, transform_indices = @transform_5, window_bounds = array<i64: 8, 1>}, {pipeline_mode = #tpu.pipeline_mode<synchronous>, transform_indices = @transform_6, window_bounds = array<i64: 8, 1>}, {pipeline_mode = #tpu.pipeline_mode<synchronous>, transform_indices = @transform_7, window_bounds = array<i64: 1, 286>}, {transform_indices = @transform_8, window_bounds = array<i64: 1, 8, 256>}]} {
    %cst = arith.constant 0.000000e+00 : bf16
    %0 = vector.broadcast %cst : bf16 to vector<4x324xbf16>
    %c0 = arith.constant 0 : index
    %c0_0 = arith.constant 0 : index
    %1 = vector.load %arg10[%c0, %c0_0] : memref<4x324xbf16, #tpu.memory_space<vmem>>, vector<4x324xbf16>
    tpu.vector_store %arg10[%c0, %c0_0], %0 {strides = array<i32>} : memref<4x324xbf16, #tpu.memory_space<vmem>>, vector<4x324xbf16>,
    %c0_1 = arith.constant 0 : index
    %c0_2 = arith.constant 0 : index
    %c0_3 = arith.constant 0 : index
    %2 = vector.load %arg1[%c0_1, %c0_2, %c0_3] : memref<1x4x256xbf16, #tpu.memory_space<vmem>>, vector<1x4x16xbf16>
    %3 = vector.shape_cast %2 : vector<1x4x16xbf16> to vector<4x16xbf16>
    %c0_4 = arith.constant 0 : index
    %c19 = arith.constant 19 : index
    %4 = vector.load %arg10[%c0_4, %c19] : memref<4x324xbf16, #tpu.memory_space<vmem>>, vector<4x16xbf16>
    tpu.vector_store %arg10[%c0_4, %c19], %3 {strides = array<i32>} : memref<4x324xbf16, #tpu.memory_space<vmem>>, vector<4x16xbf16>,
    %c0_5 = arith.constant 0 : index
    %c0_6 = arith.constant 0 : index
    %c16 = arith.constant 16 : index
    %5 = vector.load %arg1[%c0_5, %c0_6, %c16] : memref<1x4x256xbf16, #tpu.memory_space<vmem>>, vector<1x4x16xbf16>
    %6 = vector.shape_cast %5 : vector<1x4x16xbf16> to vector<4x16xbf16>
    %c0_7 = arith.constant 0 : index
    %c37 = arith.constant 37 : index
    %7 = vector.load %arg10[%c0_7, %c37] : memref<4x324xbf16, #tpu.memory_space<vmem>>, vector<4x16xbf16>
    tpu.vector_store %arg10[%c0_7, %c37], %6 {strides = array<i32>} : memref<4x324xbf16, #tpu.memory_space<vmem>>, vector<4x16xbf16>,
    %c0_8 = arith.constant 0 : index
    %c0_9 = arith.constant 0 : index
    %c32 = arith.constant 32 : index
    %8 = vector.load %arg1[%c0_8, %c0_9, %c32] : memref<1x4x256xbf16, #tpu.memory_space<vmem>>, vector<1x4x16xbf16>
    %9 = vector.shape_cast %8 : vector<1x4x16xbf16> to vector<4x16xbf16>
    %c0_10 = arith.constant 0 : index
    %c55 = arith.constant 55 : index
    %10 = vector.load %arg10[%c0_10, %c55] : memref<4x324xbf16, #tpu.memory_space<vmem>>, vector<4x16xbf16>
    tpu.vector_store %arg10[%c0_10, %c55], %9 {strides = array<i32>} : memref<4x324xbf16, #tpu.memory_space<vmem>>, vector<4x16xbf16>,
    %c0_11 = arith.constant 0 : index
    %c0_12 = arith.constant 0 : index
    %c48 = arith.constant 48 : index
    %11 = vector.load %arg1[%c0_11, %c0_12, %c48] : memref<1x4x256xbf16, #tpu.memory_space<vmem>>, vector<1x4x16xbf16>
    %12 = vector.shape_cast %11 : vector<1x4x16xbf16> to vector<4x16xbf16>
    %c0_13 = arith.constant 0 : index
    %c73 = arith.constant 73 : index
    %13 = vector.load %arg10[%c0_13, %c73] : memref<4x324xbf16, #tpu.memory_space<vmem>>, vector<4x16xbf16>
    tpu.vector_store %arg10[%c0_13, %c73], %12 {strides = array<i32>} : memref<4x324xbf16, #tpu.memory_space<vmem>>, vector<4x16xbf16>,
    %c0_14 = arith.constant 0 : index
    %c0_15 = arith.constant 0 : index
    %c64 = arith.constant 64 : index
    %14 = vector.load %arg1[%c0_14, %c0_15, %c64] : memref<1x4x256xbf16, #tpu.memory_space<vmem>>, vector<1x4x16xbf16>
    %15 = vector.shape_cast %14 : vector<1x4x16xbf16> to vector<4x16xbf16>
    %c0_16 = arith.constant 0 : index
    %c91 = arith.constant 91 : index
    %16 = vector.load %arg10[%c0_16, %c91] : memref<4x324xbf16, #tpu.memory_space<vmem>>, vector<4x16xbf16>
    tpu.vector_store %arg10[%c0_16, %c91], %15 {strides = array<i32>} : memref<4x324xbf16, #tpu.memory_space<vmem>>, vector<4x16xbf16>,
    %c0_17 = arith.constant 0 : index
    %c0_18 = arith.constant 0 : index
    %c80 = arith.constant 80 : index
    %17 = vector.load %arg1[%c0_17, %c0_18, %c80] : memref<1x4x256xbf16, #tpu.memory_space<vmem>>, vector<1x4x16xbf16>
    %18 = vector.shape_cast %17 : vector<1x4x16xbf16> to vector<4x16xbf16>
    %c0_19 = arith.constant 0 : index
    %c109 = arith.constant 109 : index
    %19 = vector.load %arg10[%c0_19, %c109] : memref<4x324xbf16, #tpu.memory_space<vmem>>, vector<4x16xbf16>
    tpu.vector_store %arg10[%c0_19, %c109], %18 {strides = array<i32>} : memref<4x324xbf16, #tpu.memory_space<vmem>>, vector<4x16xbf16>,
    %c0_20 = arith.constant 0 : index
    %c0_21 = arith.constant 0 : index
    %c96 = arith.constant 96 : index
    %20 = vector.load %arg1[%c0_20, %c0_21, %c96] : memref<1x4x256xbf16, #tpu.memory_space<vmem>>, vector<1x4x16xbf16>
    %21 = vector.shape_cast %20 : vector<1x4x16xbf16> to vector<4x16xbf16>
    %c0_22 = arith.constant 0 : index
    %c127 = arith.constant 127 : index
    %22 = vector.load %arg10[%c0_22, %c127] : memref<4x324xbf16, #tpu.memory_space<vmem>>, vector<4x16xbf16>
    tpu.vector_store %arg10[%c0_22, %c127], %21 {strides = array<i32>} : memref<4x324xbf16, #tpu.memory_space<vmem>>, vector<4x16xbf16>,
    %c0_23 = arith.constant 0 : index
    %c0_24 = arith.constant 0 : index
    %c112 = arith.constant 112 : index
    %23 = vector.load %arg1[%c0_23, %c0_24, %c112] : memref<1x4x256xbf16, #tpu.memory_space<vmem>>, vector<1x4x16xbf16>
    %24 = vector.shape_cast %23 : vector<1x4x16xbf16> to vector<4x16xbf16>
    %c0_25 = arith.constant 0 : index
    %c145 = arith.constant 145 : index
    %25 = vector.load %arg10[%c0_25, %c145] : memref<4x324xbf16, #tpu.memory_space<vmem>>, vector<4x16xbf16>
    tpu.vector_store %arg10[%c0_25, %c145], %24 {strides = array<i32>} : memref<4x324xbf16, #tpu.memory_space<vmem>>, vector<4x16xbf16>,
    %c0_26 = arith.constant 0 : index
    %c0_27 = arith.constant 0 : index
    %c128 = arith.constant 128 : index
    %26 = vector.load %arg1[%c0_26, %c0_27, %c128] : memref<1x4x256xbf16, #tpu.memory_space<vmem>>, vector<1x4x16xbf16>
    %27 = vector.shape_cast %26 : vector<1x4x16xbf16> to vector<4x16xbf16>
    %c0_28 = arith.constant 0 : index
    %c163 = arith.constant 163 : index
    %28 = vector.load %arg10[%c0_28, %c163] : memref<4x324xbf16, #tpu.memory_space<vmem>>, vector<4x16xbf16>
    tpu.vector_store %arg10[%c0_28, %c163], %27 {strides = array<i32>} : memref<4x324xbf16, #tpu.memory_space<vmem>>, vector<4x16xbf16>,
    %c0_29 = arith.constant 0 : index
    %c0_30 = arith.constant 0 : index
    %c144 = arith.constant 144 : index
    %29 = vector.load %arg1[%c0_29, %c0_30, %c144] : memref<1x4x256xbf16, #tpu.memory_space<vmem>>, vector<1x4x16xbf16>
    %30 = vector.shape_cast %29 : vector<1x4x16xbf16> to vector<4x16xbf16>
    %c0_31 = arith.constant 0 : index
    %c181 = arith.constant 181 : index
    %31 = vector.load %arg10[%c0_31, %c181] : memref<4x324xbf16, #tpu.memory_space<vmem>>, vector<4x16xbf16>
    tpu.vector_store %arg10[%c0_31, %c181], %30 {strides = array<i32>} : memref<4x324xbf16, #tpu.memory_space<vmem>>, vector<4x16xbf16>,
    %c0_32 = arith.constant 0 : index
    %c0_33 = arith.constant 0 : index
    %c160 = arith.constant 160 : index
    %32 = vector.load %arg1[%c0_32, %c0_33, %c160] : memref<1x4x256xbf16, #tpu.memory_space<vmem>>, vector<1x4x16xbf16>
    %33 = vector.shape_cast %32 : vector<1x4x16xbf16> to vector<4x16xbf16>
    %c0_34 = arith.constant 0 : index
    %c199 = arith.constant 199 : index
    %34 = vector.load %arg10[%c0_34, %c199] : memref<4x324xbf16, #tpu.memory_space<vmem>>, vector<4x16xbf16>
    tpu.vector_store %arg10[%c0_34, %c199], %33 {strides = array<i32>} : memref<4x324xbf16, #tpu.memory_space<vmem>>, vector<4x16xbf16>,
    %c0_35 = arith.constant 0 : index
    %c0_36 = arith.constant 0 : index
    %c176 = arith.constant 176 : index
    %35 = vector.load %arg1[%c0_35, %c0_36, %c176] : memref<1x4x256xbf16, #tpu.memory_space<vmem>>, vector<1x4x16xbf16>
    %36 = vector.shape_cast %35 : vector<1x4x16xbf16> to vector<4x16xbf16>
    %c0_37 = arith.constant 0 : index
    %c217 = arith.constant 217 : index
    %37 = vector.load %arg10[%c0_37, %c217] : memref<4x324xbf16, #tpu.memory_space<vmem>>, vector<4x16xbf16>
    tpu.vector_store %arg10[%c0_37, %c217], %36 {strides = array<i32>} : memref<4x324xbf16, #tpu.memory_space<vmem>>, vector<4x16xbf16>,
    %c0_38 = arith.constant 0 : index
    %c0_39 = arith.constant 0 : index
    %c192 = arith.constant 192 : index
    %38 = vector.load %arg1[%c0_38, %c0_39, %c192] : memref<1x4x256xbf16, #tpu.memory_space<vmem>>, vector<1x4x16xbf16>
    %39 = vector.shape_cast %38 : vector<1x4x16xbf16> to vector<4x16xbf16>
    %c0_40 = arith.constant 0 : index
    %c235 = arith.constant 235 : index
    %40 = vector.load %arg10[%c0_40, %c235] : memref<4x324xbf16, #tpu.memory_space<vmem>>, vector<4x16xbf16>
    tpu.vector_store %arg10[%c0_40, %c235], %39 {strides = array<i32>} : memref<4x324xbf16, #tpu.memory_space<vmem>>, vector<4x16xbf16>,
    %c0_41 = arith.constant 0 : index
    %c0_42 = arith.constant 0 : index
    %c208 = arith.constant 208 : index
    %41 = vector.load %arg1[%c0_41, %c0_42, %c208] : memref<1x4x256xbf16, #tpu.memory_space<vmem>>, vector<1x4x16xbf16>
    %42 = vector.shape_cast %41 : vector<1x4x16xbf16> to vector<4x16xbf16>
    %c0_43 = arith.constant 0 : index
    %c253 = arith.constant 253 : index
    %43 = vector.load %arg10[%c0_43, %c253] : memref<4x324xbf16, #tpu.memory_space<vmem>>, vector<4x16xbf16>
    tpu.vector_store %arg10[%c0_43, %c253], %42 {strides = array<i32>} : memref<4x324xbf16, #tpu.memory_space<vmem>>, vector<4x16xbf16>,
    %c0_44 = arith.constant 0 : index
    %c0_45 = arith.constant 0 : index
    %c224 = arith.constant 224 : index
    %44 = vector.load %arg1[%c0_44, %c0_45, %c224] : memref<1x4x256xbf16, #tpu.memory_space<vmem>>, vector<1x4x16xbf16>
    %45 = vector.shape_cast %44 : vector<1x4x16xbf16> to vector<4x16xbf16>
    %c0_46 = arith.constant 0 : index
    %c271 = arith.constant 271 : index
    %46 = vector.load %arg10[%c0_46, %c271] : memref<4x324xbf16, #tpu.memory_space<vmem>>, vector<4x16xbf16>
    tpu.vector_store %arg10[%c0_46, %c271], %45 {strides = array<i32>} : memref<4x324xbf16, #tpu.memory_space<vmem>>, vector<4x16xbf16>,
    %c0_47 = arith.constant 0 : index
    %c0_48 = arith.constant 0 : index
    %c240 = arith.constant 240 : index
    %47 = vector.load %arg1[%c0_47, %c0_48, %c240] : memref<1x4x256xbf16, #tpu.memory_space<vmem>>, vector<1x4x16xbf16>
    %48 = vector.shape_cast %47 : vector<1x4x16xbf16> to vector<4x16xbf16>
    %c0_49 = arith.constant 0 : index
    %c289 = arith.constant 289 : index
    %49 = vector.load %arg10[%c0_49, %c289] : memref<4x324xbf16, #tpu.memory_space<vmem>>, vector<4x16xbf16>
    tpu.vector_store %arg10[%c0_49, %c289], %48 {strides = array<i32>} : memref<4x324xbf16, #tpu.memory_space<vmem>>, vector<4x16xbf16>,
    %c0_50 = arith.constant 0 : index
    %c0_51 = arith.constant 0 : index
    %50 = vector.load %arg10[%c0_50, %c0_51] : memref<4x324xbf16, #tpu.memory_space<vmem>>, vector<4x286xbf16>
    %c0_52 = arith.constant 0 : index
    %c0_53 = arith.constant 0 : index
    %51 = vector.load %arg12[%c0_52, %c0_53] : memref<36x286xbf16, #tpu.memory_space<vmem>>, vector<4x286xbf16>
    tpu.vector_store %arg12[%c0_52, %c0_53], %50 {strides = array<i32>} : memref<36x286xbf16, #tpu.memory_space<vmem>>, vector<4x286xbf16>,
    %c0_54 = arith.constant 0 : index
    %c1 = arith.constant 1 : index
    %52 = vector.load %arg10[%c0_54, %c1] : memref<4x324xbf16, #tpu.memory_space<vmem>>, vector<4x286xbf16>
    %c4 = arith.constant 4 : index
    %c0_55 = arith.constant 0 : index
    %53 = vector.load %arg12[%c4, %c0_55] : memref<36x286xbf16, #tpu.memory_space<vmem>>, vector<4x286xbf16>
    tpu.vector_store %arg12[%c4, %c0_55], %52 {strides = array<i32>} : memref<36x286xbf16, #tpu.memory_space<vmem>>, vector<4x286xbf16>,
    %c0_56 = arith.constant 0 : index
    %c2 = arith.constant 2 : index
    %54 = vector.load %arg10[%c0_56, %c2] : memref<4x324xbf16, #tpu.memory_space<vmem>>, vector<4x286xbf16>
    %c8 = arith.constant 8 : index
    %c0_57 = arith.constant 0 : index
    %55 = vector.load %arg12[%c8, %c0_57] : memref<36x286xbf16, #tpu.memory_space<vmem>>, vector<4x286xbf16>
    tpu.vector_store %arg12[%c8, %c0_57], %54 {strides = array<i32>} : memref<36x286xbf16, #tpu.memory_space<vmem>>, vector<4x286xbf16>,
    %c0_58 = arith.constant 0 : index
    %c18 = arith.constant 18 : index
    %56 = vector.load %arg10[%c0_58, %c18] : memref<4x324xbf16, #tpu.memory_space<vmem>>, vector<4x286xbf16>
    %c12 = arith.constant 12 : index
    %c0_59 = arith.constant 0 : index
    %57 = vector.load %arg12[%c12, %c0_59] : memref<36x286xbf16, #tpu.memory_space<vmem>>, vector<4x286xbf16>
    tpu.vector_store %arg12[%c12, %c0_59], %56 {strides = array<i32>} : memref<36x286xbf16, #tpu.memory_space<vmem>>, vector<4x286xbf16>,
    %c0_60 = arith.constant 0 : index
    %c19_61 = arith.constant 19 : index
    %58 = vector.load %arg10[%c0_60, %c19_61] : memref<4x324xbf16, #tpu.memory_space<vmem>>, vector<4x286xbf16>
    %c16_62 = arith.constant 16 : index
    %c0_63 = arith.constant 0 : index
    %59 = vector.load %arg12[%c16_62, %c0_63] : memref<36x286xbf16, #tpu.memory_space<vmem>>, vector<4x286xbf16>
    tpu.vector_store %arg12[%c16_62, %c0_63], %58 {strides = array<i32>} : memref<36x286xbf16, #tpu.memory_space<vmem>>, vector<4x286xbf16>,
    %c0_64 = arith.constant 0 : index
    %c20 = arith.constant 20 : index
    %60 = vector.load %arg10[%c0_64, %c20] : memref<4x324xbf16, #tpu.memory_space<vmem>>, vector<4x286xbf16>
    %c20_65 = arith.constant 20 : index
    %c0_66 = arith.constant 0 : index
    %61 = vector.load %arg12[%c20_65, %c0_66] : memref<36x286xbf16, #tpu.memory_space<vmem>>, vector<4x286xbf16>
    tpu.vector_store %arg12[%c20_65, %c0_66], %60 {strides = array<i32>} : memref<36x286xbf16, #tpu.memory_space<vmem>>, vector<4x286xbf16>,
    %c0_67 = arith.constant 0 : index
    %c36 = arith.constant 36 : index
    %62 = vector.load %arg10[%c0_67, %c36] : memref<4x324xbf16, #tpu.memory_space<vmem>>, vector<4x286xbf16>
    %c24 = arith.constant 24 : index
    %c0_68 = arith.constant 0 : index
    %63 = vector.load %arg12[%c24, %c0_68] : memref<36x286xbf16, #tpu.memory_space<vmem>>, vector<4x286xbf16>
    tpu.vector_store %arg12[%c24, %c0_68], %62 {strides = array<i32>} : memref<36x286xbf16, #tpu.memory_space<vmem>>, vector<4x286xbf16>,
    %c0_69 = arith.constant 0 : index
    %c37_70 = arith.constant 37 : index
    %64 = vector.load %arg10[%c0_69, %c37_70] : memref<4x324xbf16, #tpu.memory_space<vmem>>, vector<4x286xbf16>
    %c28 = arith.constant 28 : index
    %c0_71 = arith.constant 0 : index
    %65 = vector.load %arg12[%c28, %c0_71] : memref<36x286xbf16, #tpu.memory_space<vmem>>, vector<4x286xbf16>
    tpu.vector_store %arg12[%c28, %c0_71], %64 {strides = array<i32>} : memref<36x286xbf16, #tpu.memory_space<vmem>>, vector<4x286xbf16>,
    %c0_72 = arith.constant 0 : index
    %c38 = arith.constant 38 : index
    %66 = vector.load %arg10[%c0_72, %c38] : memref<4x324xbf16, #tpu.memory_space<vmem>>, vector<4x286xbf16>
    %c32_73 = arith.constant 32 : index
    %c0_74 = arith.constant 0 : index
    %67 = vector.load %arg12[%c32_73, %c0_74] : memref<36x286xbf16, #tpu.memory_space<vmem>>, vector<4x286xbf16>
    tpu.vector_store %arg12[%c32_73, %c0_74], %66 {strides = array<i32>} : memref<36x286xbf16, #tpu.memory_space<vmem>>, vector<4x286xbf16>,
    %c0_75 = arith.constant 0 : index
    %c0_76 = arith.constant 0 : index
    %68 = vector.load %arg2[%c0_75, %c0_76] : memref<8x36xbf16, #tpu.memory_space<vmem>>, vector<8x36xbf16>
    %c0_77 = arith.constant 0 : index
    %c0_78 = arith.constant 0 : index
    %69 = vector.load %arg12[%c0_77, %c0_78] : memref<36x286xbf16, #tpu.memory_space<vmem>>, vector<36x286xbf16>
    %cst_79 = arith.constant dense<0.000000e+00> : vector<8x286xf32>
    %70 = tpu.matmul %68, %69, %cst_79 {dimension_numbers = #tpu.dot_dimension_numbers<[1], [0], [0], [1], [0, 0, 1, 1], [], []>} : vector<8x36xbf16>, vector<36x286xbf16>, vector<8x286xf32> -> vector<8x286xf32>
    %c0_80 = arith.constant 0 : index
    %c0_81 = arith.constant 0 : index
    %71 = vector.load %arg3[%c0_80, %c0_81] : memref<8x1xf32, #tpu.memory_space<vmem>>, vector<8x1xf32>
    %72 = vector.broadcast %71 : vector<8x1xf32> to vector<8x286xf32>
    %73 = arith.mulf %70, %72 : vector<8x286xf32>
    %c0_82 = arith.constant 0 : index
    %c0_83 = arith.constant 0 : index
    %74 = vector.load %arg4[%c0_82, %c0_83] : memref<8x1xf32, #tpu.memory_space<vmem>>, vector<8x1xf32>
    %75 = vector.broadcast %74 : vector<8x1xf32> to vector<8x286xf32>
    %76 = arith.addf %73, %75 : vector<8x286xf32>
    %cst_84 = arith.constant 0.000000e+00 : f32
    %77 = vector.broadcast %cst_84 : f32 to vector<8x286xf32>
    %78 = arith.maximumf %76, %77 : vector<8x286xf32>
    %c0_85 = arith.constant 0 : index
    %c0_86 = arith.constant 0 : index
    %79 = vector.load %arg8[%c0_85, %c0_86] : memref<1x286xf32, #tpu.memory_space<vmem>>, vector<1x286xf32>
    %80 = vector.broadcast %79 : vector<1x286xf32> to vector<8x286xf32>
    %81 = arith.mulf %78, %80 : vector<8x286xf32>
    %cst_87 = arith.constant 0.000000e+00 : bf16
    %82 = vector.broadcast %cst_87 : bf16 to vector<8x19xbf16>
    %c0_88 = arith.constant 0 : index
    %c0_89 = arith.constant 0 : index
    %83 = vector.load %arg11[%c0_88, %c0_89] : memref<8x324xbf16, #tpu.memory_space<vmem>>, vector<8x19xbf16>
    tpu.vector_store %arg11[%c0_88, %c0_89], %82 {strides = array<i32>} : memref<8x324xbf16, #tpu.memory_space<vmem>>, vector<8x19xbf16>,
    %cst_90 = arith.constant 0.000000e+00 : bf16
    %84 = vector.broadcast %cst_90 : bf16 to vector<8x19xbf16>
    %c0_91 = arith.constant 0 : index
    %c305 = arith.constant 305 : index
    %85 = vector.load %arg11[%c0_91, %c305] : memref<8x324xbf16, #tpu.memory_space<vmem>>, vector<8x19xbf16>
    tpu.vector_store %arg11[%c0_91, %c305], %84 {strides = array<i32>} : memref<8x324xbf16, #tpu.memory_space<vmem>>, vector<8x19xbf16>,
    %86 = arith.truncf %81 : vector<8x286xf32> to vector<8x286xbf16>
    %c0_92 = arith.constant 0 : index
    %c19_93 = arith.constant 19 : index
    %87 = vector.load %arg11[%c0_92, %c19_93] : memref<8x324xbf16, #tpu.memory_space<vmem>>, vector<8x286xbf16>
    tpu.vector_store %arg11[%c0_92, %c19_93], %86 {strides = array<i32>} : memref<8x324xbf16, #tpu.memory_space<vmem>>, vector<8x286xbf16>,
    %c0_94 = arith.constant 0 : index
    %c0_95 = arith.constant 0 : index
    %88 = vector.load %arg11[%c0_94, %c0_95] : memref<8x324xbf16, #tpu.memory_space<vmem>>, vector<8x286xbf16>
    %c0_96 = arith.constant 0 : index
    %c0_97 = arith.constant 0 : index
    %89 = vector.load %arg13[%c0_96, %c0_97] : memref<72x286xbf16, #tpu.memory_space<vmem>>, vector<8x286xbf16>
    tpu.vector_store %arg13[%c0_96, %c0_97], %88 {strides = array<i32>} : memref<72x286xbf16, #tpu.memory_space<vmem>>, vector<8x286xbf16>,
    %c0_98 = arith.constant 0 : index
    %c1_99 = arith.constant 1 : index
    %90 = vector.load %arg11[%c0_98, %c1_99] : memref<8x324xbf16, #tpu.memory_space<vmem>>, vector<8x286xbf16>
    %c8_100 = arith.constant 8 : index
    %c0_101 = arith.constant 0 : index
    %91 = vector.load %arg13[%c8_100, %c0_101] : memref<72x286xbf16, #tpu.memory_space<vmem>>, vector<8x286xbf16>
    tpu.vector_store %arg13[%c8_100, %c0_101], %90 {strides = array<i32>} : memref<72x286xbf16, #tpu.memory_space<vmem>>, vector<8x286xbf16>,
    %c0_102 = arith.constant 0 : index
    %c2_103 = arith.constant 2 : index
    %92 = vector.load %arg11[%c0_102, %c2_103] : memref<8x324xbf16, #tpu.memory_space<vmem>>, vector<8x286xbf16>
    %c16_104 = arith.constant 16 : index
    %c0_105 = arith.constant 0 : index
    %93 = vector.load %arg13[%c16_104, %c0_105] : memref<72x286xbf16, #tpu.memory_space<vmem>>, vector<8x286xbf16>
    tpu.vector_store %arg13[%c16_104, %c0_105], %92 {strides = array<i32>} : memref<72x286xbf16, #tpu.memory_space<vmem>>, vector<8x286xbf16>,
    %c0_106 = arith.constant 0 : index
    %c18_107 = arith.constant 18 : index
    %94 = vector.load %arg11[%c0_106, %c18_107] : memref<8x324xbf16, #tpu.memory_space<vmem>>, vector<8x286xbf16>
    %c24_108 = arith.constant 24 : index
    %c0_109 = arith.constant 0 : index
    %95 = vector.load %arg13[%c24_108, %c0_109] : memref<72x286xbf16, #tpu.memory_space<vmem>>, vector<8x286xbf16>
    tpu.vector_store %arg13[%c24_108, %c0_109], %94 {strides = array<i32>} : memref<72x286xbf16, #tpu.memory_space<vmem>>, vector<8x286xbf16>,
    %c0_110 = arith.constant 0 : index
    %c19_111 = arith.constant 19 : index
    %96 = vector.load %arg11[%c0_110, %c19_111] : memref<8x324xbf16, #tpu.memory_space<vmem>>, vector<8x286xbf16>
    %c32_112 = arith.constant 32 : index
    %c0_113 = arith.constant 0 : index
    %97 = vector.load %arg13[%c32_112, %c0_113] : memref<72x286xbf16, #tpu.memory_space<vmem>>, vector<8x286xbf16>
    tpu.vector_store %arg13[%c32_112, %c0_113], %96 {strides = array<i32>} : memref<72x286xbf16, #tpu.memory_space<vmem>>, vector<8x286xbf16>,
    %c0_114 = arith.constant 0 : index
    %c20_115 = arith.constant 20 : index
    %98 = vector.load %arg11[%c0_114, %c20_115] : memref<8x324xbf16, #tpu.memory_space<vmem>>, vector<8x286xbf16>
    %c40 = arith.constant 40 : index
    %c0_116 = arith.constant 0 : index
    %99 = vector.load %arg13[%c40, %c0_116] : memref<72x286xbf16, #tpu.memory_space<vmem>>, vector<8x286xbf16>
    tpu.vector_store %arg13[%c40, %c0_116], %98 {strides = array<i32>} : memref<72x286xbf16, #tpu.memory_space<vmem>>, vector<8x286xbf16>,
    %c0_117 = arith.constant 0 : index
    %c36_118 = arith.constant 36 : index
    %100 = vector.load %arg11[%c0_117, %c36_118] : memref<8x324xbf16, #tpu.memory_space<vmem>>, vector<8x286xbf16>
    %c48_119 = arith.constant 48 : index
    %c0_120 = arith.constant 0 : index
    %101 = vector.load %arg13[%c48_119, %c0_120] : memref<72x286xbf16, #tpu.memory_space<vmem>>, vector<8x286xbf16>
    tpu.vector_store %arg13[%c48_119, %c0_120], %100 {strides = array<i32>} : memref<72x286xbf16, #tpu.memory_space<vmem>>, vector<8x286xbf16>,
    %c0_121 = arith.constant 0 : index
    %c37_122 = arith.constant 37 : index
    %102 = vector.load %arg11[%c0_121, %c37_122] : memref<8x324xbf16, #tpu.memory_space<vmem>>, vector<8x286xbf16>
    %c56 = arith.constant 56 : index
    %c0_123 = arith.constant 0 : index
    %103 = vector.load %arg13[%c56, %c0_123] : memref<72x286xbf16, #tpu.memory_space<vmem>>, vector<8x286xbf16>
    tpu.vector_store %arg13[%c56, %c0_123], %102 {strides = array<i32>} : memref<72x286xbf16, #tpu.memory_space<vmem>>, vector<8x286xbf16>,
    %c0_124 = arith.constant 0 : index
    %c38_125 = arith.constant 38 : index
    %104 = vector.load %arg11[%c0_124, %c38_125] : memref<8x324xbf16, #tpu.memory_space<vmem>>, vector<8x286xbf16>
    %c64_126 = arith.constant 64 : index
    %c0_127 = arith.constant 0 : index
    %105 = vector.load %arg13[%c64_126, %c0_127] : memref<72x286xbf16, #tpu.memory_space<vmem>>, vector<8x286xbf16>
    tpu.vector_store %arg13[%c64_126, %c0_127], %104 {strides = array<i32>} : memref<72x286xbf16, #tpu.memory_space<vmem>>, vector<8x286xbf16>,
    %c0_128 = arith.constant 0 : index
    %c0_129 = arith.constant 0 : index
    %106 = vector.load %arg5[%c0_128, %c0_129] : memref<8x72xbf16, #tpu.memory_space<vmem>>, vector<8x72xbf16>
    %c0_130 = arith.constant 0 : index
    %c0_131 = arith.constant 0 : index
    %107 = vector.load %arg13[%c0_130, %c0_131] : memref<72x286xbf16, #tpu.memory_space<vmem>>, vector<72x286xbf16>
    %cst_132 = arith.constant dense<0.000000e+00> : vector<8x286xf32>
    %108 = tpu.matmul %106, %107, %cst_132 {dimension_numbers = #tpu.dot_dimension_numbers<[1], [0], [0], [1], [0, 0, 1, 1], [], []>} : vector<8x72xbf16>, vector<72x286xbf16>, vector<8x286xf32> -> vector<8x286xf32>
    %c0_133 = arith.constant 0 : index
    %c0_134 = arith.constant 0 : index
    %109 = vector.load %arg6[%c0_133, %c0_134] : memref<8x1xf32, #tpu.memory_space<vmem>>, vector<8x1xf32>
    %110 = vector.broadcast %109 : vector<8x1xf32> to vector<8x286xf32>
    %111 = arith.mulf %108, %110 : vector<8x286xf32>
    %c0_135 = arith.constant 0 : index
    %c0_136 = arith.constant 0 : index
    %112 = vector.load %arg7[%c0_135, %c0_136] : memref<8x1xf32, #tpu.memory_space<vmem>>, vector<8x1xf32>
    %113 = vector.broadcast %112 : vector<8x1xf32> to vector<8x286xf32>
    %114 = arith.addf %111, %113 : vector<8x286xf32>
    %cst_137 = arith.constant 0.000000e+00 : f32
    %115 = vector.broadcast %cst_137 : f32 to vector<8x286xf32>
    %116 = arith.maximumf %114, %115 : vector<8x286xf32>
    %117 = arith.addf %81, %116 : vector<8x286xf32>
    %118 = vector.extract_strided_slice %117 {offsets = [0, 0], sizes = [8, 16], strides = [1, 1]} : vector<8x286xf32> to vector<8x16xf32>
    %c0_138 = arith.constant 0 : index
    %c0_139 = arith.constant 0 : index
    %c0_140 = arith.constant 0 : index
    %119 = vector.load %arg9[%c0_138, %c0_139, %c0_140] : memref<1x8x256xf32, #tpu.memory_space<vmem>>, vector<1x8x16xf32>
    %120 = vector.shape_cast %119 : vector<1x8x16xf32> to vector<8x16xf32>
    %121 = vector.shape_cast %118 : vector<8x16xf32> to vector<1x8x16xf32>
    tpu.vector_store %arg9[%c0_138, %c0_139, %c0_140], %121 {strides = array<i32>} : memref<1x8x256xf32, #tpu.memory_space<vmem>>, vector<1x8x16xf32>,
    %122 = vector.extract_strided_slice %117 {offsets = [0, 18], sizes = [8, 16], strides = [1, 1]} : vector<8x286xf32> to vector<8x16xf32>
    %c0_141 = arith.constant 0 : index
    %c0_142 = arith.constant 0 : index
    %c16_143 = arith.constant 16 : index
    %123 = vector.load %arg9[%c0_141, %c0_142, %c16_143] : memref<1x8x256xf32, #tpu.memory_space<vmem>>, vector<1x8x16xf32>
    %124 = vector.shape_cast %123 : vector<1x8x16xf32> to vector<8x16xf32>
    %125 = vector.shape_cast %122 : vector<8x16xf32> to vector<1x8x16xf32>
    tpu.vector_store %arg9[%c0_141, %c0_142, %c16_143], %125 {strides = array<i32>} : memref<1x8x256xf32, #tpu.memory_space<vmem>>, vector<1x8x16xf32>,
    %126 = vector.extract_strided_slice %117 {offsets = [0, 36], sizes = [8, 16], strides = [1, 1]} : vector<8x286xf32> to vector<8x16xf32>
    %c0_144 = arith.constant 0 : index
    %c0_145 = arith.constant 0 : index
    %c32_146 = arith.constant 32 : index
    %127 = vector.load %arg9[%c0_144, %c0_145, %c32_146] : memref<1x8x256xf32, #tpu.memory_space<vmem>>, vector<1x8x16xf32>
    %128 = vector.shape_cast %127 : vector<1x8x16xf32> to vector<8x16xf32>
    %129 = vector.shape_cast %126 : vector<8x16xf32> to vector<1x8x16xf32>
    tpu.vector_store %arg9[%c0_144, %c0_145, %c32_146], %129 {strides = array<i32>} : memref<1x8x256xf32, #tpu.memory_space<vmem>>, vector<1x8x16xf32>,
    %130 = vector.extract_strided_slice %117 {offsets = [0, 54], sizes = [8, 16], strides = [1, 1]} : vector<8x286xf32> to vector<8x16xf32>
    %c0_147 = arith.constant 0 : index
    %c0_148 = arith.constant 0 : index
    %c48_149 = arith.constant 48 : index
    %131 = vector.load %arg9[%c0_147, %c0_148, %c48_149] : memref<1x8x256xf32, #tpu.memory_space<vmem>>, vector<1x8x16xf32>
    %132 = vector.shape_cast %131 : vector<1x8x16xf32> to vector<8x16xf32>
    %133 = vector.shape_cast %130 : vector<8x16xf32> to vector<1x8x16xf32>
    tpu.vector_store %arg9[%c0_147, %c0_148, %c48_149], %133 {strides = array<i32>} : memref<1x8x256xf32, #tpu.memory_space<vmem>>, vector<1x8x16xf32>,
    %134 = vector.extract_strided_slice %117 {offsets = [0, 72], sizes = [8, 16], strides = [1, 1]} : vector<8x286xf32> to vector<8x16xf32>
    %c0_150 = arith.constant 0 : index
    %c0_151 = arith.constant 0 : index
    %c64_152 = arith.constant 64 : index
    %135 = vector.load %arg9[%c0_150, %c0_151, %c64_152] : memref<1x8x256xf32, #tpu.memory_space<vmem>>, vector<1x8x16xf32>
    %136 = vector.shape_cast %135 : vector<1x8x16xf32> to vector<8x16xf32>
    %137 = vector.shape_cast %134 : vector<8x16xf32> to vector<1x8x16xf32>
    tpu.vector_store %arg9[%c0_150, %c0_151, %c64_152], %137 {strides = array<i32>} : memref<1x8x256xf32, #tpu.memory_space<vmem>>, vector<1x8x16xf32>,
    %138 = vector.extract_strided_slice %117 {offsets = [0, 90], sizes = [8, 16], strides = [1, 1]} : vector<8x286xf32> to vector<8x16xf32>
    %c0_153 = arith.constant 0 : index
    %c0_154 = arith.constant 0 : index
    %c80_155 = arith.constant 80 : index
    %139 = vector.load %arg9[%c0_153, %c0_154, %c80_155] : memref<1x8x256xf32, #tpu.memory_space<vmem>>, vector<1x8x16xf32>
    %140 = vector.shape_cast %139 : vector<1x8x16xf32> to vector<8x16xf32>
    %141 = vector.shape_cast %138 : vector<8x16xf32> to vector<1x8x16xf32>
    tpu.vector_store %arg9[%c0_153, %c0_154, %c80_155], %141 {strides = array<i32>} : memref<1x8x256xf32, #tpu.memory_space<vmem>>, vector<1x8x16xf32>,
    %142 = vector.extract_strided_slice %117 {offsets = [0, 108], sizes = [8, 16], strides = [1, 1]} : vector<8x286xf32> to vector<8x16xf32>
    %c0_156 = arith.constant 0 : index
    %c0_157 = arith.constant 0 : index
    %c96_158 = arith.constant 96 : index
    %143 = vector.load %arg9[%c0_156, %c0_157, %c96_158] : memref<1x8x256xf32, #tpu.memory_space<vmem>>, vector<1x8x16xf32>
    %144 = vector.shape_cast %143 : vector<1x8x16xf32> to vector<8x16xf32>
    %145 = vector.shape_cast %142 : vector<8x16xf32> to vector<1x8x16xf32>
    tpu.vector_store %arg9[%c0_156, %c0_157, %c96_158], %145 {strides = array<i32>} : memref<1x8x256xf32, #tpu.memory_space<vmem>>, vector<1x8x16xf32>,
    %146 = vector.extract_strided_slice %117 {offsets = [0, 126], sizes = [8, 16], strides = [1, 1]} : vector<8x286xf32> to vector<8x16xf32>
    %c0_159 = arith.constant 0 : index
    %c0_160 = arith.constant 0 : index
    %c112_161 = arith.constant 112 : index
    %147 = vector.load %arg9[%c0_159, %c0_160, %c112_161] : memref<1x8x256xf32, #tpu.memory_space<vmem>>, vector<1x8x16xf32>
    %148 = vector.shape_cast %147 : vector<1x8x16xf32> to vector<8x16xf32>
    %149 = vector.shape_cast %146 : vector<8x16xf32> to vector<1x8x16xf32>
    tpu.vector_store %arg9[%c0_159, %c0_160, %c112_161], %149 {strides = array<i32>} : memref<1x8x256xf32, #tpu.memory_space<vmem>>, vector<1x8x16xf32>,
    %150 = vector.extract_strided_slice %117 {offsets = [0, 144], sizes = [8, 16], strides = [1, 1]} : vector<8x286xf32> to vector<8x16xf32>
    %c0_162 = arith.constant 0 : index
    %c0_163 = arith.constant 0 : index
    %c128_164 = arith.constant 128 : index
    %151 = vector.load %arg9[%c0_162, %c0_163, %c128_164] : memref<1x8x256xf32, #tpu.memory_space<vmem>>, vector<1x8x16xf32>
    %152 = vector.shape_cast %151 : vector<1x8x16xf32> to vector<8x16xf32>
    %153 = vector.shape_cast %150 : vector<8x16xf32> to vector<1x8x16xf32>
    tpu.vector_store %arg9[%c0_162, %c0_163, %c128_164], %153 {strides = array<i32>} : memref<1x8x256xf32, #tpu.memory_space<vmem>>, vector<1x8x16xf32>,
    %154 = vector.extract_strided_slice %117 {offsets = [0, 162], sizes = [8, 16], strides = [1, 1]} : vector<8x286xf32> to vector<8x16xf32>
    %c0_165 = arith.constant 0 : index
    %c0_166 = arith.constant 0 : index
    %c144_167 = arith.constant 144 : index
    %155 = vector.load %arg9[%c0_165, %c0_166, %c144_167] : memref<1x8x256xf32, #tpu.memory_space<vmem>>, vector<1x8x16xf32>
    %156 = vector.shape_cast %155 : vector<1x8x16xf32> to vector<8x16xf32>
    %157 = vector.shape_cast %154 : vector<8x16xf32> to vector<1x8x16xf32>
    tpu.vector_store %arg9[%c0_165, %c0_166, %c144_167], %157 {strides = array<i32>} : memref<1x8x256xf32, #tpu.memory_space<vmem>>, vector<1x8x16xf32>,
    %158 = vector.extract_strided_slice %117 {offsets = [0, 180], sizes = [8, 16], strides = [1, 1]} : vector<8x286xf32> to vector<8x16xf32>
    %c0_168 = arith.constant 0 : index
    %c0_169 = arith.constant 0 : index
    %c160_170 = arith.constant 160 : index
    %159 = vector.load %arg9[%c0_168, %c0_169, %c160_170] : memref<1x8x256xf32, #tpu.memory_space<vmem>>, vector<1x8x16xf32>
    %160 = vector.shape_cast %159 : vector<1x8x16xf32> to vector<8x16xf32>
    %161 = vector.shape_cast %158 : vector<8x16xf32> to vector<1x8x16xf32>
    tpu.vector_store %arg9[%c0_168, %c0_169, %c160_170], %161 {strides = array<i32>} : memref<1x8x256xf32, #tpu.memory_space<vmem>>, vector<1x8x16xf32>,
    %162 = vector.extract_strided_slice %117 {offsets = [0, 198], sizes = [8, 16], strides = [1, 1]} : vector<8x286xf32> to vector<8x16xf32>
    %c0_171 = arith.constant 0 : index
    %c0_172 = arith.constant 0 : index
    %c176_173 = arith.constant 176 : index
    %163 = vector.load %arg9[%c0_171, %c0_172, %c176_173] : memref<1x8x256xf32, #tpu.memory_space<vmem>>, vector<1x8x16xf32>
    %164 = vector.shape_cast %163 : vector<1x8x16xf32> to vector<8x16xf32>
    %165 = vector.shape_cast %162 : vector<8x16xf32> to vector<1x8x16xf32>
    tpu.vector_store %arg9[%c0_171, %c0_172, %c176_173], %165 {strides = array<i32>} : memref<1x8x256xf32, #tpu.memory_space<vmem>>, vector<1x8x16xf32>,
    %166 = vector.extract_strided_slice %117 {offsets = [0, 216], sizes = [8, 16], strides = [1, 1]} : vector<8x286xf32> to vector<8x16xf32>
    %c0_174 = arith.constant 0 : index
    %c0_175 = arith.constant 0 : index
    %c192_176 = arith.constant 192 : index
    %167 = vector.load %arg9[%c0_174, %c0_175, %c192_176] : memref<1x8x256xf32, #tpu.memory_space<vmem>>, vector<1x8x16xf32>
    %168 = vector.shape_cast %167 : vector<1x8x16xf32> to vector<8x16xf32>
    %169 = vector.shape_cast %166 : vector<8x16xf32> to vector<1x8x16xf32>
    tpu.vector_store %arg9[%c0_174, %c0_175, %c192_176], %169 {strides = array<i32>} : memref<1x8x256xf32, #tpu.memory_space<vmem>>, vector<1x8x16xf32>,
    %170 = vector.extract_strided_slice %117 {offsets = [0, 234], sizes = [8, 16], strides = [1, 1]} : vector<8x286xf32> to vector<8x16xf32>
    %c0_177 = arith.constant 0 : index
    %c0_178 = arith.constant 0 : index
    %c208_179 = arith.constant 208 : index
    %171 = vector.load %arg9[%c0_177, %c0_178, %c208_179] : memref<1x8x256xf32, #tpu.memory_space<vmem>>, vector<1x8x16xf32>
    %172 = vector.shape_cast %171 : vector<1x8x16xf32> to vector<8x16xf32>
    %173 = vector.shape_cast %170 : vector<8x16xf32> to vector<1x8x16xf32>
    tpu.vector_store %arg9[%c0_177, %c0_178, %c208_179], %173 {strides = array<i32>} : memref<1x8x256xf32, #tpu.memory_space<vmem>>, vector<1x8x16xf32>,
    %174 = vector.extract_strided_slice %117 {offsets = [0, 252], sizes = [8, 16], strides = [1, 1]} : vector<8x286xf32> to vector<8x16xf32>
    %c0_180 = arith.constant 0 : index
    %c0_181 = arith.constant 0 : index
    %c224_182 = arith.constant 224 : index
    %175 = vector.load %arg9[%c0_180, %c0_181, %c224_182] : memref<1x8x256xf32, #tpu.memory_space<vmem>>, vector<1x8x16xf32>
    %176 = vector.shape_cast %175 : vector<1x8x16xf32> to vector<8x16xf32>
    %177 = vector.shape_cast %174 : vector<8x16xf32> to vector<1x8x16xf32>
    tpu.vector_store %arg9[%c0_180, %c0_181, %c224_182], %177 {strides = array<i32>} : memref<1x8x256xf32, #tpu.memory_space<vmem>>, vector<1x8x16xf32>,
    %178 = vector.extract_strided_slice %117 {offsets = [0, 270], sizes = [8, 16], strides = [1, 1]} : vector<8x286xf32> to vector<8x16xf32>
    %c0_183 = arith.constant 0 : index
    %c0_184 = arith.constant 0 : index
    %c240_185 = arith.constant 240 : index
    %179 = vector.load %arg9[%c0_183, %c0_184, %c240_185] : memref<1x8x256xf32, #tpu.memory_space<vmem>>, vector<1x8x16xf32>
    %180 = vector.shape_cast %179 : vector<1x8x16xf32> to vector<8x16xf32>
    %181 = vector.shape_cast %178 : vector<8x16xf32> to vector<1x8x16xf32>
    tpu.vector_store %arg9[%c0_183, %c0_184, %c240_185], %181 {strides = array<i32>} : memref<1x8x256xf32, #tpu.memory_space<vmem>>, vector<1x8x16xf32>,
    return
  }
  func.func @transform_0(%arg0: i32) -> (i32, i32, i32) {
    %c0_i32 = arith.constant 0 : i32
    %c0_i32_0 = arith.constant 0 : i32
    %c0_i32_1 = arith.constant 0 : i32
    return %arg0, %c0_i32, %c0_i32_0 : i32, i32, i32
  }
  func.func @transform_1(%arg0: i32) -> (i32, i32) {
    %c0_i32 = arith.constant 0 : i32
    %c0_i32_0 = arith.constant 0 : i32
    %c0_i32_1 = arith.constant 0 : i32
    return %c0_i32, %c0_i32_0 : i32, i32
  }
  func.func @transform_2(%arg0: i32) -> (i32, i32) {
    %c0_i32 = arith.constant 0 : i32
    %c0_i32_0 = arith.constant 0 : i32
    %c0_i32_1 = arith.constant 0 : i32
    return %c0_i32, %c0_i32_0 : i32, i32
  }
  func.func @transform_3(%arg0: i32) -> (i32, i32) {
    %c0_i32 = arith.constant 0 : i32
    %c0_i32_0 = arith.constant 0 : i32
    %c0_i32_1 = arith.constant 0 : i32
    return %c0_i32, %c0_i32_0 : i32, i32
  }
  func.func @transform_4(%arg0: i32) -> (i32, i32) {
    %c0_i32 = arith.constant 0 : i32
    %c0_i32_0 = arith.constant 0 : i32
    %c0_i32_1 = arith.constant 0 : i32
    return %c0_i32, %c0_i32_0 : i32, i32
  }
  func.func @transform_5(%arg0: i32) -> (i32, i32) {
    %c0_i32 = arith.constant 0 : i32
    %c0_i32_0 = arith.constant 0 : i32
    %c0_i32_1 = arith.constant 0 : i32
    return %c0_i32, %c0_i32_0 : i32, i32
  }
  func.func @transform_6(%arg0: i32) -> (i32, i32) {
    %c0_i32 = arith.constant 0 : i32
    %c0_i32_0 = arith.constant 0 : i32
    %c0_i32_1 = arith.constant 0 : i32
    return %c0_i32, %c0_i32_0 : i32, i32
  }
  func.func @transform_7(%arg0: i32) -> (i32, i32) {
    %c0_i32 = arith.constant 0 : i32
    %c0_i32_0 = arith.constant 0 : i32
    %c0_i32_1 = arith.constant 0 : i32
    return %c0_i32, %c0_i32_0 : i32, i32
  }
  func.func @transform_8(%arg0: i32) -> (i32, i32, i32) {
    %c0_i32 = arith.constant 0 : i32
    %c0_i32_0 = arith.constant 0 : i32
    %c0_i32_1 = arith.constant 0 : i32
    return %arg0, %c0_i32, %c0_i32_0 : i32, i32, i32
  }
}

</mosaic_0001>

<bundles_post_ra>
// kernel: tpu_custom_call.1
= control target key start
LH: loop header
LB: loop body
LE: loop exit
PB: predicated region body
PF: predicated region fallthrough
CT: control target
= control target key end

     0   :  { %13 = vsyncpa [#allocation7], 0  ;;  %s2074_s0 = inlined_call_operand.vmem [shape: bf16[2,4,256], index: 0, kind: input, shape index: {}]   ;;  %s2075_s1 = inlined_call_operand.vmem [shape: bf16[8,36], index: 1, kind: input, shape index: {}]   ;;  %s2076_s2 = inlined_call_operand.vmem [shape: f32[8,1], index: 2, kind: input, shape index: {}]   ;;  %s2077_s3 = inlined_call_operand.vmem [shape: f32[8,1], index: 3, kind: input, shape index: {}]   ;;  %s2078_s4 = inlined_call_operand.vmem [shape: bf16[8,72], index: 4, kind: input, shape index: {}]   ;;  %s2079_s5 = inlined_call_operand.vmem [shape: f32[8,1], index: 5, kind: input, shape index: {}]   ;;  %s2080_s6 = inlined_call_operand.vmem [shape: f32[8,1], index: 6, kind: input, shape index: {}]   ;;  %s2081_s7 = inlined_call_operand.vmem [shape: f32[1,286], index: 7, kind: input, shape index: {}]   ;;  %s2082_s8 = inlined_call_operand.hbm [shape: f32[2,8,256], index: 8, kind: output, shape index: {}]  }
   0x1   :  { %15 = vsyncpa [#allocation7 + $0x1], 0  ;;  %s1750_s27 = smov 0   ;;  %s1752_s28 = smov 0  }
   0x2   :  { %s1754_s29 = smov 0   ;;  %s1756_s30 = smov 0  }
   0x3 LB: > { %s1771_s9 = sadd.s32 4294967295, %s1662_s30   ;;  %s1411_s10 = sadd.s32 4294967294, %s1662_s30   ;;  %s1662_s30 = sphi %s1756_s30, %s2088_s30   ;;  %s1658_s29 = sphi %s1754_s29, %s2087_s29   ;;  %s1654_s28 = sphi %s1752_s28, %s2086_s28   ;;  %s1650_s27 = sphi %s1750_s27, %s2085_s27  }
   0x4   : > { %s1775_s11 = sadd.s32 1, %s1662_s30   ;;  %s201_s12 = sadd.s32 1, %s1658_s29 }
   0x5   : > { %s198_s13 = ssub.s32 %s1662_s30, %s1775_s11  ;;  %p211_p0 = scmp.ne.s32.totalorder %s1658_s29, %s1654_s28 }
   0x6   : > { %p199_p1 = scmp.eq.s32.totalorder %s198_s13, 0  ;;  %p212_p2 = scmp.eq.s32.totalorder %s1771_s9, 1 }
   0x7   : > { %p217_p3 = scmp.ne.s32.totalorder %s1654_s28, %s1650_s27  ;;  %p218_p4 = scmp.eq.s32.totalorder %s1411_s10, 1 }
   0x8   : > { %s1786_s14 = scalar_select %p199_p1, %s1658_s29, %s201_s12  }
   0x9   : > { %p1788_p5 = por %p212_p2, %p211_p0  ;;  %p1792_p6 = por %p218_p4, %p217_p3 }
   0xa   : > { %p1414_p7 = scmp.ge.s32.totalorder %s1662_s30, 1  ;;  %p265_p8 = scmp.lt.s32.totalorder %s1662_s30, 3 }
   0xc   : > { %p266_p9 = pnand %p1414_p7, %p265_p8 }
   0xd   : > { %p299_p10 = scmp.lt.s32.totalorder (!%p266_p9), %s1771_s9, 1  ;;  %vm305_vm0 = vcmask (!%p266_p9), 1041408   ;;  %vm306_vm1 = vcmask (!%p266_p9), 1043458   ;;  %vm308_vm2 = vcmask (!%p266_p9), 553988   ;;  %v1664_v0 = vmov (!%p266_p9), 0   ;;  %s1665_s22 = smov (!%p266_p9), 23  }
   0xe   : > { %269 = sbr.rel (%p266_p9) target bundleno = 1230 (0x4ce), region = 52  ;;  %vm307_vm3 = vmor (!%p266_p9), %vm306_vm1, %vm305_vm0  ;;  %793 = vmatprep.mubr.bf16.mxu0 (!%p266_p9), %v1664_v0  ;;  %1573 = vset.pattern.permute.xlu0 (!%p266_p9), %v1664_v0  ;;  %s1666_s23 = smov (!%p266_p9), 19   ;;  %vm316_vm5 = vcmask (!%p266_p9), 279704   ;;  %vm323_vm6 = vcmask (!%p266_p9), 427304   ;;  %vm330_vm7 = vcmask (!%p266_p9), 574904   ;;  %vm337_vm8 = vcmask (!%p266_p9), 722504  }
   0xf   : > { %vm309_vm4 = vmor (!%p266_p9), %vm308_vm2, %vm307_vm3  ;;  %1574 = vset.pattern.permute.xlu1 (!%p266_p9), %v1664_v0  ;;  %s1667_s24 = smov (!%p266_p9), 25   ;;  %s1668_s25 = smov (!%p266_p9), 21   ;;  %vm344_vm9 = vcmask (!%p266_p9), 870104   ;;  %vm361_vm10 = vcmask (!%p266_p9), 1042424   ;;  %vm362_vm11 = vcmask (!%p266_p9), 117762   ;;  %vm358_vm12 = vcmask (!%p266_p9), 252928  }
  0x10   : > { %310 = vst.msk [vmem:[#allocation2] sm:$0x3f] (!%p266_p9), %vm309_vm4, %v1664_v0  ;;  %s1669_s26 = smov (!%p266_p9), 27   ;;  %s1670_s10 = smov (!%p266_p9), 31   ;;  %vm351_vm13 = vcmask (!%p266_p9), 1017704   ;;  %vm363_vm14 = vmor (!%p266_p9), %vm362_vm11, %vm361_vm10  ;;  %vm370_vm15 = vcmask (!%p266_p9), 263304   ;;  %v446_v37 = vlaneseq (!%p266_p9) }
  0x11   : > { %s1671_s12 = smov (!%p266_p9), 33   ;;  %s1672_s13 = smov (!%p266_p9), 29   ;;  %vm377_vm1 = vcmask (!%p266_p9), 410904   ;;  %vm384_vm2 = vcmask (!%p266_p9), 558504   ;;  %vm391_vm3 = vcmask (!%p266_p9), 706104   ;;  %vm415_vm4 = vcmask (!%p266_p9), 1042408  }
  0x12   : > { %s1675_s19 = smov (!%p266_p9), 45   ;;  %s1676_s20 = smov (!%p266_p9), 39   ;;  %vm424_vm10 = vcmask (!%p266_p9), 246904   ;;  %v1681_v35 = vmov (!%p266_p9), 1983009808   ;;  %vm431_vm11 = vcmask (!%p266_p9), 394504  }
  0x13   : > { %v444_v36 = vunpack.c.l.s4 (!%p266_p9), %v1681_v35  ;;  %v1827_v41 = vshrl.u32 (!%p266_p9), %v446_v37, 7 }
  0x15   : > { %s300_s17 = scalar_select %p299_p10, %s1771_s9, 1  ;;  %v445_v40 = vunpack.c.0.s8 %v444_v36 }
  0x17   : > { %s1456_s18 = sshll.u32 %s300_s17, 2  ;;  %s1673_s17 = smov 37   ;;  %v1830_v42 = vsub.s32 %v445_v40, %v1827_v41 }
  0x18   : > { %s1808_s21 = scalar_lea.vmem %s2074_s0, %s1456_s18  ;;  %s1674_s18 = smov 35  }
  0x19   : > { %v325_v1 = vld [vmem:[%s1808_s21] sm:$0x3]  ;;  %v379_v9 = vld [vmem:[%s1808_s21 + $0x2] sm:$0x3] }
  0x1a   : > { %v311_v2 = vld [vmem:[%s1808_s21] sm:$0x3]  ;;  %327 = vrot.lane.b32.xlu1 %v325_v1, %s1665_s22  ;;  %v372_v10 = vld [vmem:[%s1808_s21 + $0x2] sm:$0x3]  ;;  %s1677_s22 = smov 41  }
  0x1b   : > { %313 = vrot.lane.b32.xlu0 %v311_v2, %s1666_s23  ;;  %v332_v3 = vld [vmem:[%s1808_s21] sm:$0x3]  ;;  %v407_v11 = vld [vmem:[%s1808_s21 + $0x2] sm:$0x3] }
  0x1c   : > { %v318_v4 = vld [vmem:[%s1808_s21] sm:$0x3]  ;;  %v386_v12 = vld [vmem:[%s1808_s21 + $0x2] sm:$0x3] }
  0x1d   : > { %v339_v5 = vld [vmem:[%s1808_s21] sm:$0x3]  ;;  %v393_v13 = vld [vmem:[%s1808_s21 + $0x2] sm:$0x3] }
  0x1e   : > { %334 = vrot.lane.b32.xlu1 %v332_v3, %s1667_s24  ;;  %v353_v6 = vld [vmem:[%s1808_s21] sm:$0x3]  ;;  %v400_v14 = vld [vmem:[%s1808_s21 + $0x2] sm:$0x3]  ;;  %s1678_s24 = smov 43  }
  0x1f   : > { %320 = vrot.lane.b32.xlu0 %v318_v4, %s1668_s25  ;;  %v365_v7 = vld [vmem:[%s1808_s21] sm:$0x3]  ;;  %v419_v15 = vld [vmem:[%s1808_s21 + $0x2] sm:$0x3]  ;;  %s1679_s25 = smov 47  }
  0x20   : > { %v346_v8 = vld [vmem:[%s1808_s21] sm:$0x3]  ;;  %v426_v16 = vld [vmem:[%s1808_s21 + $0x2] sm:$0x3]  ;;  %s1682_s21 = smov 126  }
  0x22   : > { %341 = vrot.lane.b32.xlu1 %v339_v5, %s1669_s26  ;;  %s1680_s26 = smov 49   ;;  %v1689_v5 = vmov 0.0  }
  0x23   : > { %355 = vrot.lane.b32.xlu0 %v353_v6, %s1670_s10  ;;  %s1683_s10 = smov 127   ;;  %1470 = vmatprep.subr.bf16.mxu1 %v1689_v5 }
  0x26   : > { %367 = vrot.lane.b32.xlu1 %v365_v7, %s1671_s12  ;;  %s1684_s12 = smov 109  }
  0x27   : > { %348 = vrot.lane.b32.xlu0 %v346_v8, %s1672_s13  ;;  %s1685_s13 = smov 110  }
  0x2a   : > { %381 = vrot.lane.b32.xlu1 %v379_v9, %s1673_s17  ;;  %s1686_s17 = smov 92  }
  0x2b   : > { %374 = vrot.lane.b32.xlu0 %v372_v10, %s1674_s18  ;;  %s1687_s18 = smov 108  }
  0x2e   : > { %409 = vrot.lane.b32.xlu1 %v407_v11, %s1675_s19  ;;  %s1688_s19 = smov 91  }
  0x2f   : > { %388 = vrot.lane.b32.xlu0 %v386_v12, %s1676_s20  ;;  %s1690_s20 = smov 90  }
  0x32   : > { %402 = vrot.lane.b32.xlu1 %v400_v14, %s1678_s24 }
  0x33   : > { %395 = vrot.lane.b32.xlu0 %v393_v13, %s1677_s22  ;;  %s1697_s22 = smov 120  }
  0x36   : > { %428 = vrot.lane.b32.xlu1 %v426_v16, %s1680_s26  ;;  %v842_v16 = vld [vmem:[%s2076_s2] sm:$0xff]  ;;  %s1692_s26 = smov 100  }
  0x37   : > { %421 = vrot.lane.b32.xlu0 %v419_v15, %s1679_s25 }
  0x8c   : > { %v328_v17 = vpop.permute.xlu1 %327 }
  0x8d   : > { %v314_v18 = vpop.permute.xlu0 %313 }
  0x8e   : > { %317 = vst.msk [vmem:[#allocation2] sm:$0x3] %vm316_vm5, %v314_v18  ;;  %vm416_vm5 = vcmask 101378  }
  0x90   : > { %v335_v19 = vpop.permute.xlu1 %334 }
  0x91   : > { %v321_v20 = vpop.permute.xlu0 %320 }
  0x92   : > { %324 = vst.msk [vmem:[#allocation2] sm:$0x3] %vm323_vm6, %v321_v20  ;;  %vm398_vm6 = vcmask 853704  }
  0x93   : > { %331 = vst.msk [vmem:[#allocation2] sm:$0x3] %vm330_vm7, %v328_v17  ;;  %vm412_vm7 = vcmask 367616   ;;  %v851_v17 = vld [vmem:[%s2077_s3] sm:$0xff] }
  0x94   : > { %338 = vst.msk [vmem:[#allocation2] sm:$0x3] %vm337_vm8, %v335_v19  ;;  %v342_v21 = vpop.permute.xlu1 %341  ;;  %vm405_vm8 = vcmask 1001304  }
  0x95   : > { %v356_v22 = vpop.permute.xlu0 %355  ;;  %345 = vst.msk [vmem:[#allocation2] sm:$0x3] %vm344_vm9, %v342_v21  ;;  %vm417_vm9 = vmor %vm416_vm5, %vm415_vm4  ;;  %vm571_vm4 = vcmask 891904   ;;  %vm601_vm5 = vcmask 883712  }
  0x96   : > { %v357_v23 = vrot.slane %v356_v22, 6 }
  0x98   : > { %v368_v24 = vpop.permute.xlu1 %367  ;;  %v359_v26 = vsel %vm358_vm12, %v357_v23, %v356_v22  ;;  %vm453_vm12 = vcmask 238592  }
  0x99   : > { %v349_v25 = vpop.permute.xlu0 %348 }
  0x9a   : > { %352 = vst.msk [vmem:[#allocation2] sm:$0x3] %vm351_vm13, %v349_v25  ;;  %vm1691_vm13 = vmmov 0  }
  0x9b   : > { %364 = vst.msk [vmem:[#allocation2] sm:$0xf] %vm363_vm14, %v359_v26  ;;  %1476 = vmatprep.mubr.msk.bf16.mxu1 %vm1691_vm13, %v1689_v5  ;;  %vm485_vm14 = vcmask 240642  }
  0x9c   : > { %371 = vst.msk [vmem:[#allocation2 + $0x2] sm:$0x3] %vm370_vm15, %v368_v24  ;;  %v382_v27 = vpop.permute.xlu1 %381  ;;  %vm478_vm15 = vcmask 1043456  }
  0x9d   : > { %v375_v28 = vpop.permute.xlu0 %374 }
  0x9e   : > { %378 = vst.msk [vmem:[#allocation2 + $0x2] sm:$0x3] %vm377_vm1, %v375_v28  ;;  %vm480_vm1 = vcmask 1039360  }
  0x9f   : > { %385 = vst.msk [vmem:[#allocation2 + $0x2] sm:$0x3] %vm384_vm2, %v382_v27  ;;  %vm511_vm2 = vcmask 1031168  }
  0xa0   : > { %v410_v29 = vpop.permute.xlu1 %409 }
  0xa1   : > { %v389_v30 = vpop.permute.xlu0 %388  ;;  %v411_v31 = vrot.slane %v410_v29, 6 }
  0xa2   : > { %392 = vst.msk [vmem:[#allocation2 + $0x2] sm:$0x3] %vm391_vm3, %v389_v30  ;;  %vm541_vm3 = vcmask 900096  }
  0xa3   : > { %v413_v34 = vsel %vm412_vm7, %v411_v31, %v410_v29  ;;  %vm661_vm7 = vcmask 744448  }
  0xa4   : > { %v403_v33 = vpop.permute.xlu1 %402 }
  0xa5   : > { %v396_v32 = vpop.permute.xlu0 %395 }
  0xa6   : > { %399 = vst.msk [vmem:[#allocation2 + $0x2] sm:$0x3] %vm398_vm6, %v396_v32  ;;  %vm631_vm6 = vcmask 752640  }
  0xa7   : > { %406 = vst.msk [vmem:[#allocation2 + $0x2] sm:$0x3] %vm405_vm8, %v403_v33  ;;  %vm691_vm8 = vcmask 736256  }
  0xa8   : > { %418 = vst.msk [vmem:[#allocation2 + $0x2] sm:$0xf] %vm417_vm9, %v413_v34  ;;  %v429_v39 = vpop.permute.xlu1 %428  ;;  %vm748_vm9 = vcmask 293888  }
  0xa9   : > { %v422_v38 = vpop.permute.xlu0 %421 }
  0xaa   : > { %425 = vst.msk [vmem:[#allocation2 + $0x4] sm:$0x3] %vm424_vm10, %v422_v38  ;;  %vm883_vm10 = vcmask 150528  }
  0xab   : > { %432 = vst.msk [vmem:[#allocation2 + $0x4] sm:$0x3] %vm431_vm11, %v429_v39  ;;  %vm908_vm11 = vcmask 1043608  }
  0xac   : > { %884 = vst.msk [vmem:[#allocation3] sm:$0xf] %vm883_vm10, %v1664_v0  ;;  %vm917_vm10 = vcmask 240640  }
  0xb2   : > { %v487_v43 = vld [vmem:[#allocation2] sm:$0x3f] }
  0xb3   : > { %v455_v44 = vld [vmem:[#allocation2] sm:$0x3f]  ;;  %v496_v45 = vrot.slane %v487_v43, %v1830_v42  ;;  %v489_v62 = vcombine.high %v487_v43, %v487_v43 }
  0xb4   : > { %v471_v46 = vrot.slane %v455_v44, %v1830_v42  ;;  %v547_v47 = vld [vmem:[#allocation2] sm:$0x3f]  ;;  %v457_v57 = vcombine.low %v455_v44, %v455_v44 }
  0xb5   : > { %v517_v48 = vld [vmem:[#allocation2] sm:$0x3f]  ;;  %504 = vrot.lane.b32.xlu0 %v496_v45, %s1682_s21  ;;  %v556_v50 = vrot.slane %v547_v47, %v1830_v42  ;;  %v503_v1 = vrot.slane %v489_v62, %v1830_v42  ;;  %v549_v3 = vcombine.high %v547_v47, %v547_v47 }
  0xb6   : > { %v433_v49 = vld [vmem:[#allocation2] sm:$0x3f]  ;;  %474 = vrot.lane.b32.xlu1 %v471_v46, %s1683_s10  ;;  %v533_v51 = vrot.slane %v517_v48, %v1830_v42  ;;  %v464_v61 = vrot.slane %v457_v57, %v1830_v42  ;;  %v519_v63 = vcombine.low %v517_v48, %v517_v48 }
  0xb7   : > { %1418 = vst.sshfl [vmem:[#allocation4] sm:$0xf pattern:$0x76325410] %v433_v49  ;;  %v607_v52 = vld [vmem:[#allocation2] sm:$0x3f]  ;;  %v435_v54 = vcombine.high %v433_v49, %v433_v49  ;;  %v563_v6 = vrot.slane %v549_v3, %v1830_v42 }
  0xb8   : > { %v577_v53 = vld [vmem:[#allocation2] sm:$0x3f]  ;;  %v616_v55 = vrot.slane %v607_v52, %v1830_v42  ;;  %v526_v2 = vrot.slane %v519_v63, %v1830_v42  ;;  %v609_v8 = vcombine.high %v607_v52, %v607_v52 }
  0xb9   : > { %564 = vrot.lane.b32.xlu0 %v556_v50, %s1684_s12  ;;  %v593_v56 = vrot.slane %v577_v53, %v1830_v42  ;;  %v449_v58 = vrot.slane %v435_v54, %v1830_v42  ;;  %v637_v59 = vld [vmem:[#allocation2] sm:$0x3f]  ;;  %v579_v4 = vcombine.low %v577_v53, %v577_v53 }
  0xba   : > { %536 = vrot.lane.b32.xlu1 %v533_v51, %s1685_s13  ;;  %v653_v60 = vrot.slane %v637_v59, %v1830_v42  ;;  %v639_v9 = vcombine.low %v637_v59, %v637_v59  ;;  %v667_v10 = vld [vmem:[#allocation2] sm:$0x3f]  ;;  %v623_v11 = vrot.slane %v609_v8, %v1830_v42 }
  0xbb   : > { %454 = vst.msk [vmem:[#allocation4 + $0x8] sm:$0x3] %vm453_vm12, %v449_v58  ;;  %v586_v7 = vrot.slane %v579_v4, %v1830_v42  ;;  %v669_v13 = vcombine.high %v667_v10, %v667_v10  ;;  %v676_v15 = vrot.slane %v667_v10, %v1830_v42 }
  0xbc   : > { %v646_v12 = vrot.slane %v639_v9, %v1830_v42 }
  0xbd   : > { %624 = vrot.lane.b32.xlu0 %v616_v55, %s1686_s17  ;;  %v683_v14 = vrot.slane %v669_v13, %v1830_v42 }
  0xbe   : > { %596 = vrot.lane.b32.xlu1 %v593_v56, %s1687_s18 }
  0xc1   : > { %472 = vrot.lane.b32.xlu0 %v464_v61, %s1683_s10 }
  0xc2   : > { %656 = vrot.lane.b32.xlu1 %v653_v60, %s1688_s19 }
  0xc5   : > { %534 = vrot.lane.b32.xlu0 %v526_v2, %s1685_s13 }
  0xc6   : > { %506 = vrot.lane.b32.xlu1 %v503_v1, %s1682_s21 }
  0xc9   : > { %594 = vrot.lane.b32.xlu0 %v586_v7, %s1687_s18 }
  0xca   : > { %566 = vrot.lane.b32.xlu1 %v563_v6, %s1684_s12 }
  0xcd   : > { %654 = vrot.lane.b32.xlu0 %v646_v12, %s1688_s19 }
  0xce   : > { %626 = vrot.lane.b32.xlu1 %v623_v11, %s1686_s17 }
  0xd1   : > { %684 = vrot.lane.b32.xlu0 %v676_v15, %s1690_s20 }
  0xd2   : > { %686 = vrot.lane.b32.xlu1 %v683_v14, %s1690_s20  ;;  %v697_v14 = vld [vmem:[%s2075_s1] sm:$0xf] }
  0xd5   : > { %845 = vperm.xlu0 %1573, %v842_v16  }
  0xd6   : > { %854 = vperm.xlu1 %1574, %v851_v17  }
 0x127   : > { %v505_v18 = vpop.permute.xlu0 %504 }
 0x128   : > { %v475_v19 = vpop.permute.xlu1 %474  ;;  %v508_v32 = vrot.slane %v505_v18, 4 }
 0x129   : > { %486 = vst.msk [vmem:[#allocation4 + $0x8] sm:$0xc] %vm485_vm14, %v475_v19  ;;  %v477_v26 = vrot.slane %v475_v19, 4  ;;  %v875_v19 = vsub.s32 2, %v1827_v41 }
 0x12b   : > { %v565_v20 = vpop.permute.xlu0 %564 }
 0x12c   : > { %v537_v21 = vpop.permute.xlu1 %536  ;;  %v568_v43 = vrot.slane %v565_v20, 4 }
 0x12d   : > { %546 = vst.msk [vmem:[#allocation4 + $0x14] sm:$0xc] %vm485_vm14, %v537_v21  ;;  %v539_v33 = vrot.slane %v537_v21, 4 }
 0x12f   : > { %v625_v22 = vpop.permute.xlu0 %624 }
 0x130   : > { %v597_v23 = vpop.permute.xlu1 %596  ;;  %v628_v54 = vrot.slane %v625_v22, 4 }
 0x131   : > { %606 = vst.msk [vmem:[#allocation4 + $0x20] sm:$0xc] %vm485_vm14, %v597_v23  ;;  %v599_v44 = vrot.slane %v597_v23, 4 }
 0x133   : > { %v473_v25 = vpop.permute.xlu0 %472 }
 0x134   : > { %v657_v24 = vpop.permute.xlu1 %656  ;;  %v476_v27 = vrot.slane %v473_v25, 4 }
 0x135   : > { %666 = vst.msk [vmem:[#allocation4 + $0x2c] sm:$0xc] %vm485_vm14, %v657_v24  ;;  %v659_v55 = vrot.slane %v657_v24, 4 }
 0x136   : > { %v479_v28 = vsel %vm478_vm15, %v476_v27, %v477_v26 }
 0x137   : > { %v481_v29 = vsel %vm480_vm1, %v473_v25, %v479_v28  ;;  %v535_v31 = vpop.permute.xlu0 %534  ;;  %v867_v28 = vsub.s32 0, %v1827_v41 }
 0x138   : > { %v507_v30 = vpop.permute.xlu1 %506  ;;  %484 = vst [vmem:[#allocation4] sm:$0xcc] %v481_v29  ;;  %v538_v35 = vrot.slane %v535_v31, 4 }
 0x139   : > { %v509_v34 = vrot.slane %v507_v30, 4  ;;  %516 = vst.msk [vmem:[#allocation4 + $0x14] sm:$0x3] %vm453_vm12, %v507_v30 }
 0x13a   : > { %v540_v37 = vsel %vm478_vm15, %v538_v35, %v539_v33 }
 0x13b   : > { %v510_v36 = vsel %vm478_vm15, %v508_v32, %v509_v34  ;;  %v542_v39 = vsel %vm541_vm3, %v535_v31, %v540_v37  ;;  %v595_v42 = vpop.permute.xlu0 %594  ;;  %v871_v31 = vsub.s32 1, %v1827_v41 }
 0x13c   : > { %v512_v38 = vsel %vm511_vm2, %v505_v18, %v510_v36  ;;  %v567_v40 = vpop.permute.xlu1 %566  ;;  %545 = vst [vmem:[#allocation4 + $0xc] sm:$0xcc] %v542_v39  ;;  %v598_v46 = vrot.slane %v595_v42, 4 }
 0x13d   : > { %515 = vst [vmem:[#allocation4 + $0xc] sm:$0x33] %v512_v38  ;;  %v569_v45 = vrot.slane %v567_v40, 4  ;;  %576 = vst.msk [vmem:[#allocation4 + $0x20] sm:$0x3] %vm453_vm12, %v567_v40 }
 0x13e   : > { %v600_v48 = vsel %vm478_vm15, %v598_v46, %v599_v44 }
 0x13f   : > { %v570_v47 = vsel %vm478_vm15, %v568_v43, %v569_v45  ;;  %v602_v50 = vsel %vm601_vm5, %v595_v42, %v600_v48  ;;  %v655_v52 = vpop.permute.xlu0 %654 }
 0x140   : > { %v572_v49 = vsel %vm571_vm4, %v565_v20, %v570_v47  ;;  %v627_v51 = vpop.permute.xlu1 %626  ;;  %v1584_v53 = vld [vmem:[#allocation4 + $0x8] ss:$12 sps:$4 sm:$0xff]   ;;  %605 = vst [vmem:[#allocation4 + $0x18] sm:$0xcc] %v602_v50  ;;  %v658_v57 = vrot.slane %v655_v52, 4 }
 0x141   : > { %575 = vst [vmem:[#allocation4 + $0x18] sm:$0x33] %v572_v49  ;;  %v629_v56 = vrot.slane %v627_v51, 4  ;;  %636 = vst.msk [vmem:[#allocation4 + $0x2c] sm:$0x3] %vm453_vm12, %v627_v51  ;;  %1471 = vmatpush3.bf16.msra.mxu1 %v1584_v53 }
 0x142   : > { %v660_v59 = vsel %vm478_vm15, %v658_v57, %v659_v55  ;;  %1472 = vmatprep.subr.bf16.mxu1 %v1689_v5 }
 0x143   : > { %v630_v58 = vsel %vm478_vm15, %v628_v54, %v629_v56  ;;  %v662_v61 = vsel %vm661_vm7, %v655_v52, %v660_v59  ;;  %v685_v63 = vpop.permute.xlu0 %684 }
 0x144   : > { %v632_v60 = vsel %vm631_vm6, %v625_v22, %v630_v58  ;;  %v687_v62 = vpop.permute.xlu1 %686  ;;  %v1585_v1 = vld [vmem:[#allocation4 + $0x4] ss:$12 sps:$4 sm:$0xff]   ;;  %v1587_v2 = vld [vmem:[#allocation4] ss:$12 sps:$4 sm:$0xff]   ;;  %665 = vst [vmem:[#allocation4 + $0x24] sm:$0xcc] %v662_v61 }
 0x145   : > { %635 = vst [vmem:[#allocation4 + $0x24] sm:$0x33] %v632_v60  ;;  %v689_v3 = vrot.slane %v687_v62, 4  ;;  %696 = vst.msk [vmem:[#allocation4 + $0x38] sm:$0x3] %vm453_vm12, %v687_v62  ;;  %v688_v4 = vrot.slane %v685_v63, 4  ;;  %761 = vmatprep.subr.bf16.mxu0 %v1585_v1 }
 0x146   : > { %762 = vmatpush1.bf16.msra.mxu0 %v1587_v2  ;;  %v863_v22 = vld [vmem:[%s2081_s7] sm:$0x7]  ;;  %vm909_vm12 = vcmask 1047556  }
 0x147   : > { %v690_v6 = vsel %vm478_vm15, %v688_v4, %v689_v3  ;;  %v876_v29 = vrot.slane %v863_v22, %v875_v19  ;;  %v868_v39 = vrot.slane %v863_v22, %v867_v28  ;;  %v872_v43 = vrot.slane %v863_v22, %v871_v31  ;;  %vm910_vm14 = vmor %vm909_vm12, %vm908_vm11  ;;  %v1242_v1 = vld [vmem:[%s2080_s6] sm:$0xff] }
 0x148   : > { %v692_v7 = vsel %vm691_vm8, %v685_v63, %v690_v6  ;;  %v1588_v8 = vld [vmem:[#allocation4 + $0x20] ss:$12 sps:$4 sm:$0xff]   ;;  %vm1329_vm11 = vcmask 818176  }
 0x149   : > { %695 = vst [vmem:[#allocation4 + $0x30] sm:$0x33] %v692_v7  ;;  %1473 = vmatpush3.bf16.msra.mxu1 %v1588_v8  ;;  %v1233_v63 = vld [vmem:[%s2079_s5] sm:$0xff] }
 0x14a   : > { %1474 = vmatprep.subr.bf16.mxu1 %v1689_v5 }
 0x14c   : > { %v1589_v9 = vld [vmem:[#allocation4 + $0x1c] ss:$12 sps:$4 sm:$0xff]   ;;  %v1591_v10 = vld [vmem:[#allocation4 + $0x18] ss:$12 sps:$4 sm:$0xff]  }
 0x14d   : > { %v1592_v11 = vld [vmem:[#allocation4 + $0x38] ss:$0 sps:$4 sm:$0x33]   ;;  %763 = vmatprep.subr.bf16.mxu0 %v1589_v9 }
 0x14e   : > { %764 = vmatpush1.bf16.msra.mxu0 %v1591_v10  ;;  %v759_v12 = vsel %vm305_vm0, %v1592_v11, 0 }
 0x14f   : > { %1475 = vmatpush3.bf16.msra.mxu1 %v759_v12 }
 0x150   : > { %v706_v13 = vld [vmem:[#allocation4 + $0x30] sm:$0x33]  ;;  %1480 = vmatprep.subr.bf16.mxu1 %v1689_v5 }
 0x151   : > { %v1426_v15 = vcombine.high %v706_v13, %v706_v13  ;;  %v1425_v16 = vcombine.low %v706_v13, %v706_v13 }
 0x152   : > { %1477 = vmatmul.mubr.msk.bf16.vlgmr.msra.gmra.mrb[0].mxu1 %vm748_vm9, %v697_v14 }
 0x153   : > { %1428 = vmatprep.subr.msk.bf16.mxu0 %vm305_vm0, %v1426_v15  ;;  %v753_v17 = vsel %vm305_vm0, %v1425_v16, 0  ;;  %1490 = vmatprep.mubr.msk.bf16.mxu1 %vm1691_vm13, %v1689_v5  ;;  %vm885_vm0 = vcmask 552328   ;;  %vm903_vm13 = vcmask 154624  }
 0x154   : > { %766 = vmatpush1.bf16.msra.mxu0 %v753_v17  ;;  %v846_v18 = vpop.permute.xlu0 %845  ;;  %886 = vst.msk [vmem:[#allocation3 + $0x8] sm:$0xf] %vm885_vm0, %v1664_v0  ;;  %vm1298_vm0 = vcmask 1048448  }
 0x155   : > { %v855_v21 = vpop.permute.xlu1 %854 }
 0x157   : > { %1429 = vmatmul.mubr.msk.bf16.vlgmr.msra.gmra.mrb[0].mxu0 %vm748_vm9, %v697_v14  ;;  %vm912_vm9 = vcmask 396288  }
 0x158   : > { %1184 = vmatprep.mubr.bf16.mxu0 %v1664_v0 }
 0x225   : > { %v836_v20 = vpop.f32.mrb[0].mxu1 }
 0x226   : > { %v850_v23 = vmul.f32 %v846_v18, %v836_v20  ;;  %v1478_v24 = vpop.f32.mrb[1].mxu1 }
 0x227   : > { %v839_v25 = vpop.f32.mrb[2].mxu1 }
 0x228   : > { %v859_v26 = vadd.f32 %v855_v21, %v850_v23  ;;  %v1479_v27 = vpop.f32.mrb[3].mxu1 }
 0x22a   : > { %v795_v30 = vpop.f32.mrb[0].mxu0  ;;  %v862_v34 = vmax.f32 %v859_v26, 0.0 }
 0x22b   : > { %v848_v32 = vmul.f32 %v846_v18, %v795_v30  ;;  %v797_v33 = vpop.f32.mrb[1].mxu0 }
 0x22c   : > { %v849_v35 = vmul.f32 %v846_v18, %v797_v33  ;;  %v799_v36 = vpop.f32.mrb[2].mxu0  ;;  %v1914_v40 = vmul.f32 %v876_v29, %v862_v34 }
 0x22d   : > { %v857_v37 = vadd.f32 %v855_v21, %v848_v32  ;;  %v800_v38 = vpop.f32.mrb[3].mxu0 }
 0x22e   : > { %v858_v42 = vadd.f32 %v855_v21, %v849_v35  ;;  %v1458_v45 = vpack.c.bf16 %v1914_v40, %v1914_v40 }
 0x22f   : > { %v860_v44 = vmax.f32 %v857_v37, 0.0 }
 0x230   : > { %v861_v46 = vmax.f32 %v858_v42, 0.0  ;;  %900 = vrot.lane.b32.xlu0 %v1458_v45, %s1666_s23 }
 0x231   : > { %v1918_v47 = vmul.f32 %v868_v39, %v860_v44 }
 0x232   : > { %v1922_v41 = vmul.f32 %v872_v43, %v861_v46 }
 0x234   : > { %v1457_v48 = vpack.c.bf16 %v1922_v41, %v1918_v47 }
 0x236   : > { %898 = vrot.lane.b32.xlu1 %v1457_v48, %s1666_s23  ;;  %s1693_s23 = smov 124  }
 0x2a2   : > { %v901_v51 = vpop.permute.xlu0 %900 }
 0x2a8   : > { %v899_v49 = vpop.permute.xlu1 %898 }
 0x2a9   : > { %v902_v50 = vrot.slane %v899_v49, 4 }
 0x2ab   : > { %v904_v52 = vsel %vm903_vm13, %v902_v50, %v899_v49  ;;  %v905_v53 = vsel %vm903_vm13, %v902_v50, %v901_v51 }
 0x2ac   : > { %911 = vst.msk [vmem:[#allocation3] sm:$0xff] %vm910_vm14, %v904_v52 }
 0x2ad   : > { %913 = vst.msk [vmem:[#allocation3 + $0x8] sm:$0xf] %vm912_vm9, %v905_v53 }
 0x2b3   : > { %v914_v0 = vld [vmem:[#allocation3] sm:$0xff] }
 0x2b4   : > { %v915_v54 = vld [vmem:[#allocation3 + $0x8] sm:$0xf]  ;;  %923 = vrot.lane.b32.xlu1 %v914_v0, %s1683_s10 }
 0x2b5   : > { %v920_v55 = vld [vmem:[#allocation3 + $0x8] sm:$0xf]  ;;  %918 = vst.msk [vmem:[#allocation5 + $0x8] sm:$0xf] %vm917_vm10, %v915_v54 }
 0x2b6   : > { %925 = vrot.lane.b32.xlu0 %v920_v55, %s1683_s10  ;;  %v936_v56 = vld [vmem:[#allocation3 + $0x8] sm:$0xf]  ;;  %s1694_s10 = smov 114  }
 0x2b7   : > { %v952_v57 = vld [vmem:[#allocation3 + $0x8] sm:$0xf] }
 0x2b8   : > { %939 = vrot.lane.b32.xlu1 %v914_v0, %s1682_s21  ;;  %v968_v58 = vld [vmem:[#allocation3 + $0x8] sm:$0xf] }
 0x2b9   : > { %v984_v59 = vld [vmem:[#allocation3 + $0x8] sm:$0xf] }
 0x2ba   : > { %941 = vrot.lane.b32.xlu0 %v936_v56, %s1682_s21  ;;  %v1000_v60 = vld [vmem:[#allocation3 + $0x8] sm:$0xf] }
 0x2bb   : > { %v1016_v61 = vld [vmem:[#allocation3 + $0x8] sm:$0xf] }
 0x2bc   : > { %955 = vrot.lane.b32.xlu1 %v914_v0, %s1685_s13  ;;  %v1032_v62 = vld [vmem:[#allocation3 + $0x8] sm:$0xf] }
 0x2be   : > { %957 = vrot.lane.b32.xlu0 %v952_v57, %s1685_s13 }
 0x2c0   : > { %971 = vrot.lane.b32.xlu1 %v914_v0, %s1684_s12 }
 0x2c2   : > { %973 = vrot.lane.b32.xlu0 %v968_v58, %s1684_s12  ;;  %s1695_s12 = smov 122  }
 0x2c4   : > { %987 = vrot.lane.b32.xlu1 %v914_v0, %s1687_s18 }
 0x2c6   : > { %989 = vrot.lane.b32.xlu0 %v984_v59, %s1687_s18 }
 0x2c8   : > { %1003 = vrot.lane.b32.xlu1 %v914_v0, %s1686_s17 }
 0x2ca   : > { %1005 = vrot.lane.b32.xlu0 %v1000_v60, %s1686_s17  ;;  %s1698_s17 = smov 118  }
 0x2cc   : > { %1019 = vrot.lane.b32.xlu1 %v914_v0, %s1688_s19 }
 0x2ce   : > { %1021 = vrot.lane.b32.xlu0 %v1016_v61, %s1688_s19  ;;  %s1699_s19 = smov 116  }
 0x2d0   : > { %1035 = vrot.lane.b32.xlu1 %v914_v0, %s1690_s20 }
 0x2d2   : > { %1037 = vrot.lane.b32.xlu0 %v1032_v62, %s1690_s20  ;;  %s296_s20 = sand.u32 1, %s1654_s28  }
 0x2d3   : > { %s1415_s24 = sshll.u32 %s296_s20, 4 }
 0x2d4   : > { %1236 = vperm.xlu1 %1574, %v1233_v63   ;;  %s1989_s25 = scalar_lea.vmem [#allocation6], %s1415_s24  ;;  %s1700_s24 = smov 106  }
 0x2d6   : > { %1245 = vperm.xlu0 %1573, %v1242_v1  }
 0x326   : > { %v924_v2 = vpop.permute.xlu1 %923 }
 0x327   : > { %v927_v4 = vrot.slane %v924_v2, 4 }
 0x328   : > { %v926_v3 = vpop.permute.xlu0 %925 }
 0x329   : > { %v928_v6 = vrot.slane %v926_v3, 4  ;;  %934 = vst.msk [vmem:[#allocation5 + $0x14] sm:$0xf] %vm917_vm10, %v926_v3 }
 0x32a   : > { %v940_v9 = vpop.permute.xlu1 %939 }
 0x32b   : > { %v929_v7 = vsel %vm478_vm15, %v927_v4, %v928_v6  ;;  %v943_v11 = vrot.slane %v940_v9, 4  ;;  %v1047_v4 = vld [vmem:[%s2078_s4] sm:$0xf] }
 0x32c   : > { %v930_v8 = vsel %vm480_vm1, %v924_v2, %v929_v7  ;;  %v942_v10 = vpop.permute.xlu0 %941  ;;  %vm1138_vm1 = vcmask 588800  }
 0x32d   : > { %v944_v12 = vrot.slane %v942_v10, 4  ;;  %950 = vst.msk [vmem:[#allocation5 + $0x20] sm:$0xf] %vm917_vm10, %v942_v10  ;;  %v1433_v13 = vcombine.low %v914_v0, %v930_v8  ;;  %v1434_v14 = vcombine.high %v914_v0, %v930_v8 }
 0x32e   : > { %v956_v17 = vpop.permute.xlu1 %955 }
 0x32f   : > { %v945_v15 = vsel %vm478_vm15, %v943_v11, %v944_v12  ;;  %1152 = vmatprep.subr.bf16.mxu0 %v1434_v14  ;;  %v959_v20 = vrot.slane %v956_v17, 4 }
 0x330   : > { %v946_v16 = vsel %vm511_vm2, %v940_v9, %v945_v15  ;;  %v958_v18 = vpop.permute.xlu0 %957  ;;  %v1595_v19 = vld [vmem:[#allocation5 + $0x8] ss:$12 sps:$4 sm:$0xff]   ;;  %1153 = vmatpush1.bf16.msra.mxu0 %v1433_v13  ;;  %vm1263_vm2 = vcmask 261248  }
 0x331   : > { %v960_v21 = vrot.slane %v958_v18, 4  ;;  %966 = vst.msk [vmem:[#allocation5 + $0x2c] sm:$0xf] %vm917_vm10, %v958_v18  ;;  %1481 = vmatpush3.bf16.msra.mxu1 %v1595_v19 }
 0x332   : > { %1482 = vmatprep.subr.bf16.mxu1 %v1689_v5  ;;  %v972_v24 = vpop.permute.xlu1 %971 }
 0x333   : > { %v961_v22 = vsel %vm478_vm15, %v959_v20, %v960_v21  ;;  %v975_v26 = vrot.slane %v972_v24, 4 }
 0x334   : > { %v962_v23 = vsel %vm541_vm3, %v956_v17, %v961_v22  ;;  %v974_v25 = vpop.permute.xlu0 %973  ;;  %vm1268_vm3 = vcmask 392448  }
 0x335   : > { %v976_v27 = vrot.slane %v974_v25, 4  ;;  %982 = vst.msk [vmem:[#allocation5 + $0x38] sm:$0xf] %vm917_vm10, %v974_v25  ;;  %v1436_v28 = vcombine.low %v946_v16, %v962_v23  ;;  %v1437_v29 = vcombine.high %v946_v16, %v962_v23 }
 0x336   : > { %v988_v32 = vpop.permute.xlu1 %987 }
 0x337   : > { %v977_v30 = vsel %vm478_vm15, %v975_v26, %v976_v27  ;;  %1154 = vmatprep.subr.bf16.mxu0 %v1437_v29  ;;  %v991_v35 = vrot.slane %v988_v32, 4 }
 0x338   : > { %v978_v31 = vsel %vm571_vm4, %v972_v24, %v977_v30  ;;  %v990_v33 = vpop.permute.xlu0 %989  ;;  %v1596_v34 = vld [vmem:[#allocation5 + $0x20] ss:$12 sps:$4 sm:$0xff]   ;;  %1155 = vmatpush1.bf16.msra.mxu0 %v1436_v28  ;;  %vm1273_vm4 = vcmask 523648  }
 0x339   : > { %v992_v36 = vrot.slane %v990_v33, 4  ;;  %998 = vst.msk [vmem:[#allocation5 + $0x44] sm:$0xf] %vm917_vm10, %v990_v33  ;;  %1483 = vmatpush3.bf16.msra.mxu1 %v1596_v34 }
 0x33a   : > { %1484 = vmatprep.subr.bf16.mxu1 %v1689_v5  ;;  %v1004_v39 = vpop.permute.xlu1 %1003 }
 0x33b   : > { %v993_v37 = vsel %vm478_vm15, %v991_v35, %v992_v36  ;;  %v1007_v43 = vrot.slane %v1004_v39, 4 }
 0x33c   : > { %v994_v38 = vsel %vm601_vm5, %v988_v32, %v993_v37  ;;  %v1006_v42 = vpop.permute.xlu0 %1005  ;;  %vm1278_vm5 = vcmask 654848  }
 0x33d   : > { %v1008_v44 = vrot.slane %v1006_v42, 4  ;;  %1014 = vst.msk [vmem:[#allocation5 + $0x50] sm:$0xf] %vm917_vm10, %v1006_v42  ;;  %v1439_v45 = vcombine.low %v978_v31, %v994_v38  ;;  %v1440_v46 = vcombine.high %v978_v31, %v994_v38 }
 0x33e   : > { %v1020_v50 = vpop.permute.xlu1 %1019 }
 0x33f   : > { %v1009_v48 = vsel %vm478_vm15, %v1007_v43, %v1008_v44  ;;  %1156 = vmatprep.subr.bf16.mxu0 %v1440_v46  ;;  %v1023_v53 = vrot.slane %v1020_v50, 4 }
 0x340   : > { %v1010_v49 = vsel %vm631_vm6, %v1004_v39, %v1009_v48  ;;  %v1022_v51 = vpop.permute.xlu0 %1021  ;;  %v1597_v52 = vld [vmem:[#allocation5 + $0x38] ss:$12 sps:$4 sm:$0xff]   ;;  %1157 = vmatpush1.bf16.msra.mxu0 %v1439_v45  ;;  %vm1283_vm6 = vcmask 786048  }
 0x341   : > { %v1024_v0 = vrot.slane %v1022_v51, 4  ;;  %1030 = vst.msk [vmem:[#allocation5 + $0x5c] sm:$0xf] %vm917_vm10, %v1022_v51  ;;  %1485 = vmatpush3.bf16.msra.mxu1 %v1597_v52 }
 0x342   : > { %1486 = vmatprep.subr.bf16.mxu1 %v1689_v5  ;;  %v1036_v56 = vpop.permute.xlu1 %1035 }
 0x343   : > { %v1025_v54 = vsel %vm478_vm15, %v1023_v53, %v1024_v0  ;;  %v1039_v58 = vrot.slane %v1036_v56, 4 }
 0x344   : > { %v1026_v55 = vsel %vm661_vm7, %v1020_v50, %v1025_v54  ;;  %v1038_v57 = vpop.permute.xlu0 %1037  ;;  %vm1288_vm7 = vcmask 917248  }
 0x345   : > { %v1040_v59 = vrot.slane %v1038_v57, 4  ;;  %1046 = vst.msk [vmem:[#allocation5 + $0x68] sm:$0xf] %vm917_vm10, %v1038_v57  ;;  %v1442_v60 = vcombine.low %v1010_v49, %v1026_v55  ;;  %v1443_v61 = vcombine.high %v1010_v49, %v1026_v55 }
 0x347   : > { %v1041_v62 = vsel %vm478_vm15, %v1039_v58, %v1040_v59  ;;  %1158 = vmatprep.subr.bf16.mxu0 %v1443_v61 }
 0x348   : > { %v1042_v63 = vsel %vm691_vm8, %v1036_v56, %v1041_v62  ;;  %v1598_v1 = vld [vmem:[#allocation5 + $0x50] ss:$12 sps:$4 sm:$0xff]   ;;  %1159 = vmatpush1.bf16.msra.mxu0 %v1442_v60  ;;  %vm1295_vm8 = vcmask 932864  }
 0x349   : > { %v1446_v2 = vcombine.high %v1042_v63, %v1042_v63  ;;  %v1445_v3 = vcombine.low %v1042_v63, %v1042_v63  ;;  %1487 = vmatpush3.bf16.msra.mxu1 %v1598_v1 }
 0x34a   : > { %1488 = vmatprep.subr.bf16.mxu1 %v1689_v5 }
 0x34b   : > { %1448 = vmatprep.subr.msk.bf16.mxu0 %vm478_vm15, %v1446_v2  ;;  %v1144_v6 = vsel %vm478_vm15, %v1445_v3, 0 }
 0x34c   : > { %v1599_v7 = vld [vmem:[#allocation5 + $0x68] ss:$0 sps:$4 sm:$0xff]   ;;  %1161 = vmatpush1.bf16.msra.mxu0 %v1144_v6 }
 0x34d   : > { %v1150_v8 = vsel %vm478_vm15, %v1599_v7, 0  ;;  %vm1257_vm15 = vcmask 130048  }
 0x34e   : > { %1489 = vmatpush3.bf16.msra.mxu1 %v1150_v8 }
 0x34f   : > { %1449 = vmatmul.mubr.msk.bf16.vlgmr.msra.gmra.mrb[4].mxu0 %vm1138_vm1, %v1047_v4 }
 0x351   : > { %1491 = vmatmul.mubr.msk.bf16.vlgmr.msra.gmra.mrb[4].mxu1 %vm1138_vm1, %v1047_v4 }
 0x353   : > { %v1237_v9 = vpop.permute.xlu1 %1236 }
 0x355   : > { %v1246_v12 = vpop.permute.xlu0 %1245 }
 0x422   : > { %v1186_v10 = vpop.f32.mrb[4].mxu0 }
 0x423   : > { %v1239_v5 = vmul.f32 %v1237_v9, %v1186_v10  ;;  %v1188_v11 = vpop.f32.mrb[5].mxu0 }
 0x424   : > { %v1190_v13 = vpop.f32.mrb[6].mxu0  ;;  %v1227_v14 = vpop.f32.mrb[4].mxu1  ;;  %v1240_v23 = vmul.f32 %v1237_v9, %v1188_v11 }
 0x425   : > { %v1248_v15 = vadd.f32 %v1246_v12, %v1239_v5  ;;  %v1191_v16 = vpop.f32.mrb[7].mxu0  ;;  %v1241_v17 = vmul.f32 %v1237_v9, %v1227_v14  ;;  %v1492_v18 = vpop.f32.mrb[5].mxu1 }
 0x426   : > { %v1230_v19 = vpop.f32.mrb[6].mxu1  ;;  %v1249_v26 = vadd.f32 %v1246_v12, %v1240_v23 }
 0x427   : > { %v1251_v20 = vmax.f32 %v1248_v15, 0.0  ;;  %v1250_v21 = vadd.f32 %v1246_v12, %v1241_v17  ;;  %v1493_v22 = vpop.f32.mrb[7].mxu1 }
 0x428   : > { %v1252_v28 = vmax.f32 %v1249_v26, 0.0 }
 0x429   : > { %v1254_v24 = vadd.f32 %v1251_v20, %v1918_v47  ;;  %v1253_v25 = vmax.f32 %v1250_v21, 0.0 }
 0x42a   : > { %v1255_v47 = vadd.f32 %v1252_v28, %v1922_v41 }
 0x42b   : > { %1260 = vrot.lane.b32.xlu0 %v1254_v24, %s1682_s21  ;;  %1258 = vst.msk [vmem:[%s1989_s25] sm:$0xff] %vm1257_vm15, %v1254_v24  ;;  %v1256_v27 = vadd.f32 %v1253_v25, %v1914_v40  ;;  %s1696_s21 = smov 112  }
 0x42d   : > { %1327 = vrot.lane.b32.xlu1 %v1256_v27, %s1692_s26 }
 0x42f   : > { %1265 = vrot.lane.b32.xlu0 %v1254_v24, %s1693_s23  ;;  %s1701_s23 = smov 104  }
 0x431   : > { %1291 = vrot.lane.b32.xlu1 %v1254_v24, %s1694_s10 }
 0x433   : > { %1270 = vrot.lane.b32.xlu0 %v1254_v24, %s1695_s12  ;;  %s1702_s12 = smov 102  }
 0x435   : > { %1300 = vrot.lane.b32.xlu1 %v1255_v47, %s1696_s21  ;;  %s1703_s21 = smov 98  }
 0x437   : > { %1275 = vrot.lane.b32.xlu0 %v1254_v24, %s1697_s22 }
 0x439   : > { %1304 = vrot.lane.b32.xlu1 %v1255_v47, %s1685_s13  ;;  %s1459_s13 = sshll.u32 %s1771_s9, 8  ;;  %s1338_s9 = scalar_lea.sflag [#allocation7], %s296_s20 }
 0x43a   : > { %s2029_s22 = scalar_lea.hbm %s2082_s8, %s1459_s13 }
 0x43b   : > { %1280 = vrot.lane.b32.xlu0 %v1254_v24, %s1698_s17 }
 0x43d   : > { %1308 = vrot.lane.b32.xlu1 %v1255_v47, %s1687_s18  ;;  %s1352_s18 = sshll.u32 %s1989_s25, 4  ;;  %s2031_s18 = int_to_ptr.vmem [resolvable:$true] %s1352_s18 }
 0x43e   : > { %s1600_s17 = scalar_lea.vmem %s2031_s18, 256 }
 0x43f   : > { %1285 = vrot.lane.b32.xlu0 %v1254_v24, %s1699_s19  ;;  %p1601_p11 = scmp.ne.s32.totalorder %s2031_s18, %s1600_s17  ;;  %s1704_s19 = smov [#allocation6]  }
 0x441   : > { %1312 = vrot.lane.b32.xlu1 %v1255_v47, %s1700_s24  ;;  %p1602_p12 = pnand %p1601_p11, %p1788_p5  ;;  %s1604_s24 = sshll.u32 %s1704_s19, 4  ;;  %s1605_s24 = int_to_ptr.vmem [resolvable:$false] %s1604_s24 }
 0x442   : > { %p1607_p0 = scmp.lt.s32.totalorder %s2031_s18, %s1605_s24 }
 0x443   : > { %1325 = vrot.lane.b32.xlu0 %v1255_v47, %s1692_s26  ;;  %p1603_p13 = pneg %p1602_p12 }
 0x445   : > { %1316 = vrot.lane.b32.xlu1 %v1255_v47, %s1701_s23  ;;  %s1606_s23 = scalar_lea.vmem %s1605_s24, 512 }
 0x446   : > { %p1608_p1 = scmp.lt.s32.totalorder %s1606_s23, %s1600_s17 }
 0x447   : > { %1293 = vrot.lane.b32.xlu0 %v1255_v47, %s1694_s10 }
 0x448   : > { %p1609_p2 = por %p1608_p1, %p1607_p0 }
 0x449   : > { %1320 = vrot.lane.b32.xlu1 %v1255_v47, %s1702_s12 }
 0x44a   : > { %p1610_p3 = pnand %p1609_p2, %p1603_p13 }
 0x44d   : > { %1333 = vrot.lane.b32.xlu1 %v1256_v27, %s1703_s21 }
 0x49d   : > { %v1261_v40 = vpop.permute.xlu0 %1260 }
 0x49e   : > { %1264 = vst.msk [vmem:[%s1989_s25] sm:$0xff] %vm1263_vm2, %v1261_v40 }
 0x49f   : > { %v1328_v41 = vpop.permute.xlu1 %1327 }
 0x4a1   : > { %v1266_v29 = vpop.permute.xlu0 %1265 }
 0x4a2   : > { %1269 = vst.msk [vmem:[%s1989_s25] sm:$0xff] %vm1268_vm3, %v1266_v29 }
 0x4a3   : > { %v1292_v30 = vpop.permute.xlu1 %1291 }
 0x4a5   : > { %v1271_v31 = vpop.permute.xlu0 %1270 }
 0x4a6   : > { %1274 = vst.msk [vmem:[%s1989_s25] sm:$0xff] %vm1273_vm4, %v1271_v31 }
 0x4a7   : > { %v1301_v32 = vpop.permute.xlu1 %1300 }
 0x4a8   : > { %1303 = vst.msk [vmem:[%s1989_s25 + $0x8] sm:$0xff] %vm1257_vm15, %v1301_v32 }
 0x4a9   : > { %v1276_v33 = vpop.permute.xlu0 %1275 }
 0x4aa   : > { %1279 = vst.msk [vmem:[%s1989_s25] sm:$0xff] %vm1278_vm5, %v1276_v33 }
 0x4ab   : > { %v1305_v34 = vpop.permute.xlu1 %1304 }
 0x4ac   : > { %1307 = vst.msk [vmem:[%s1989_s25 + $0x8] sm:$0xff] %vm1263_vm2, %v1305_v34 }
 0x4ad   : > { %v1281_v35 = vpop.permute.xlu0 %1280 }
 0x4ae   : > { %1284 = vst.msk [vmem:[%s1989_s25] sm:$0xff] %vm1283_vm6, %v1281_v35 }
 0x4af   : > { %v1309_v36 = vpop.permute.xlu1 %1308 }
 0x4b0   : > { %1311 = vst.msk [vmem:[%s1989_s25 + $0x8] sm:$0xff] %vm1268_vm3, %v1309_v36 }
 0x4b1   : > { %v1286_v37 = vpop.permute.xlu0 %1285 }
 0x4b2   : > { %1289 = vst.msk [vmem:[%s1989_s25] sm:$0xff] %vm1288_vm7, %v1286_v37 }
 0x4b3   : > { %v1313_v38 = vpop.permute.xlu1 %1312 }
 0x4b4   : > { %1315 = vst.msk [vmem:[%s1989_s25 + $0x8] sm:$0xff] %vm1273_vm4, %v1313_v38 }
 0x4b5   : > { %v1326_v39 = vpop.permute.xlu0 %1325 }
 0x4b6   : > { %v1330_v46 = vsel %vm1329_vm11, %v1326_v39, %v1328_v41 }
 0x4b7   : > { %v1317_v42 = vpop.permute.xlu1 %1316 }
 0x4b8   : > { %1319 = vst.msk [vmem:[%s1989_s25 + $0x8] sm:$0xff] %vm1278_vm5, %v1317_v42 }
 0x4b9   : > { %v1294_v43 = vpop.permute.xlu0 %1293 }
 0x4ba   : > { %v1296_v44 = vsel %vm1295_vm8, %v1292_v30, %v1294_v43 }
 0x4bb   : > { %1299 = vst.msk [vmem:[%s1989_s25] sm:$0xff] %vm1298_vm0, %v1296_v44  ;;  %v1321_v45 = vpop.permute.xlu1 %1320 }
 0x4bc   : > { %1323 = vst.msk [vmem:[%s1989_s25 + $0x8] sm:$0xff] %vm1283_vm6, %v1321_v45 }
 0x4bd   : > { %1332 = vst.msk [vmem:[%s1989_s25 + $0x8] sm:$0xff] %vm1288_vm7, %v1330_v46 }
 0x4bf   : > { %v1334_v48 = vpop.permute.xlu1 %1333 }
 0x4c0   : > { %1336 = vst.msk [vmem:[%s1989_s25 + $0x8] sm:$0xff] %vm1298_vm0, %v1334_v48 }
 0x4c1   : > { %1613 = shalt.err (!%p1610_p3)
}
 0x4c2   : > { %s1614_s20 = scalar_lea.hbm %s2029_s22, 256  ;;  %s1618_s21 = scalar_lea.hbm %s2082_s8, 512 }
 0x4c3   : > { %p1615_p4 = scmp.ne.s32.totalorder %s2029_s22, %s1614_s20  ;;  %p1619_p9 = scmp.lt.u32.totalorder %s2029_s22, %s2082_s8 }
 0x4c4   : > { %p1620_p10 = scmp.lt.u32.totalorder %s1618_s21, %s1614_s20  ;;  %p1622_p12 = scmp.lt.u32.totalorder %s1614_s20, %s2029_s22 }
 0x4c5   : > { %p1616_p7 = pnand %p1615_p4, %p1788_p5 }
 0x4c6   : > { %p1621_p11 = por %p1620_p10, %p1619_p9 }
 0x4c7   : > { %p1617_p8 = pneg %p1616_p7 }
 0x4c8   : > { %p1623_p13 = por %p1622_p12, %p1621_p11 }
 0x4ca   : > { %p1624_p0 = pnand %p1623_p13, %p1617_p8 }
 0x4cc   : > { %1627 = shalt.err (!%p1624_p0)
}
 0x4cd   : > { %1494 = dma.vmem_to_hbm [thread:$0]  (%p1788_p5), %s2031_s18, 256, %s2029_s22, %s1338_s9  }
 0x4ce PF: > { %p1500_p1 = scmp.ge.s32.totalorder %s1662_s30, 2  ;;  %s1364_s10 = sand.u32 1, %s1650_s27  }
 0x4cf   : > { %s1365_s17 = scalar_lea.sflag [#allocation7], %s1364_s10 }
 0x4d0   : > { %p1497_p2 = pnand %p1500_p1, %p1792_p6 }
 0x4d2   : > { %1645 = dma.done.wait (!%p1497_p2), %s1365_s17, 256  }
 0x4d3   : > { %1647 = vsyncadd (!%p1497_p2), %s1365_s17, 4294967040  ;;  %p18_p3 = scmp.ge.s32.totalorder %s1775_s11, 4   ;;  %s2085_s27 = smov %s1654_s28 }
 0x4d4   : > { %s2086_s28 = smov %s1658_s29  ;;  %s2087_s29 = smov %s1786_s14 }
 0x4d5   : > { %s2088_s30 = smov %s1775_s11  ;;  %20 = sbr.rel (!%p18_p3) target bundleno = 3 (0x3), region = 87 }
 0x4dc   :  { %1370 = vsyncpa [#allocation7], 1 }
 0x4dd   :  { %1372 = vsyncpa [#allocation7 + $0x1], 1 }

</bundles_post_ra>
